<compile_context>
chip_gen: v6e
topology: v6e:2x2x1
jax: 0.10.0
libtpu: 0.0.40
codegen_flags: <defaults>
</compile_context>

<pallas_src>
import math
import functools

import jax
import jax.numpy as jnp
from jax import lax
from jax.experimental import pallas as pl
from jax.experimental.pallas import tpu as pltpu

_F32 = jnp.float32
_BF16 = jnp.bfloat16


# ----------------------------- small helpers ------------------------------

def _full_spec(shape):
    """Whole-array VMEM block for a grid=(1,) pallas_call."""
    nd = len(shape)

    def imap(i):
        return (0,) * nd

    return pl.BlockSpec(tuple(shape), imap)


_SMEM_SPEC = pl.BlockSpec(memory_space=pltpu.MemorySpace.SMEM)
_CPARAMS = pltpu.CompilerParams(dimension_semantics=("arbitrary",))


def _dot(a, b):
    """MXU matmul with bf16 operands and f32 accumulation."""
    return jnp.dot(a.astype(_BF16), b.astype(_BF16), preferred_element_type=_F32)


def _gelu(y):  # exact erf-based GELU (nn.GELU() default)
    return 0.5 * y * (1.0 + lax.erf(y * (1.0 / math.sqrt(2.0))))


def _layernorm(x, g, b):
    mu = jnp.mean(x, axis=-1, keepdims=True)
    d = x - mu
    var = jnp.mean(d * d, axis=-1, keepdims=True)
    return d * lax.rsqrt(var + 1e-5) * g + b


# ----------------------------- Pallas kernels -----------------------------

def _encode_kernel(x_ref, eeig_ref, fft_ref,
                   fw1_ref, fb1_ref, fw2_ref, fb2_ref,
                   ew_ref, eb_ref, fftw_ref, fftb_ref,
                   h_ref, eig_ref):
    # feat_encoder: Linear -> ReLU -> Linear  (norm == 'none' branch)
    h1 = jnp.maximum(_dot(x_ref[...], fw1_ref[...]) + fb1_ref[...], 0.0)
    h_ref[...] = _dot(h1, fw2_ref[...]) + fb2_ref[...]
    # eig = SineEncoding projection + FFTEncoding projection
    eig_ref[...] = (_dot(eeig_ref[...], ew_ref[...]) + eb_ref[...]
                    + _dot(fft_ref[...], fftw_ref[...]) + fftb_ref[...])


def _transformer_kernel(eig_ref,
                        mha_g_ref, mha_b_ref,
                        w12_ref, b12_ref,
                        wqkv_ref,
                        wo_ref, bo_ref,
                        n2_g_ref, n2_b_ref,
                        wm1_ref, bm1_ref, wm2_ref, bm2_ref,
                        fn_g_ref, fn_b_ref,
                        wf1_ref, bf1_ref, wf2_ref, bf2_ref,
                        wdec_ref, bdec_ref,
                        conv_w_ref, conv_b_ref,
                        newe_ref):
    N, H = eig_ref.shape
    scale = 1.0 / math.sqrt(H)

    eig = eig_ref[...]

    # ---- Block1 / LinearAttention ----
    # NOTE: the reference computes norm1(x) and immediately discards it, so it is skipped.
    xn = _layernorm(eig, mha_g_ref[...], mha_b_ref[...])          # mha_eig

    # fused linear1 || linear2 projection
    ty = _dot(xn, w12_ref[...]) + b12_ref[...]                    # (N, 2H)
    t = ty[:, :H]                                                 # linear1(x)
    y_gate = 1.0 / (1.0 + jnp.exp(-ty[:, H:]))                    # sigmoid(linear2(x))

    # single-channel 3x3 conv (zero padding 1) on the (N, H) "image", then GELU
    zc = jnp.zeros((N, 1), _F32)
    zr = jnp.zeros((1, H + 2), _F32)
    xp = jnp.concatenate([zr, jnp.concatenate([zc, t, zc], axis=1), zr], axis=0)
    acc = jnp.zeros((N, H), _F32)
    for di in range(3):
        for dj in range(3):
            acc = acc + conv_w_ref[di, dj] * xp[di:di + N, dj:dj + H]
    xc = _gelu(acc + conv_b_ref[0])

    # fused q || k || v projection (bias-free)
    qkv = _dot(xc, wqkv_ref[...])                                 # (N, 3H)

    def elu1(v):  # ELU(alpha=1) + 1
        return jnp.where(v > 0.0, v, jnp.exp(jnp.minimum(v, 0.0)) - 1.0) + 1.0

    q = elu1(qkv[:, :H])
    k = elu1(qkv[:, H:2 * H])
    v = qkv[:, 2 * H:]

    # softmax(v @ k^T * scale) @ q ; k^T folded into dot_general (no transpose copy)
    s = lax.dot_general(v.astype(_BF16), k.astype(_BF16),
                        (((1,), (1,)), ((), ())),
                        preferred_element_type=_F32) * scale
    s = s - jnp.max(s, axis=-1, keepdims=True)
    ps = jnp.exp(s)
    ps = ps * pl.reciprocal(jnp.sum(ps, axis=-1, keepdims=True), approx=True)
    att = _dot(ps, q)

    a = _dot(att * y_gate, wo_ref[...]) + bo_ref[...] + xc        # LinearAttention out
    x1 = a + xn                                                   # Block1 residual

    # ---- Block1 MLP ----
    x2 = _layernorm(x1, n2_g_ref[...], n2_b_ref[...])
    x2 = _gelu(_dot(x2, wm1_ref[...]) + bm1_ref[...])
    x2 = _dot(x2, wm2_ref[...]) + bm2_ref[...]
    eig2 = eig + (x2 + x1)                                        # mha residual

    # ---- outer FFN ----
    fz = _layernorm(eig2, fn_g_ref[...], fn_b_ref[...])
    fz = _gelu(_dot(fz, wf1_ref[...]) + bf1_ref[...])
    fz = _dot(fz, wf2_ref[...]) + bf2_ref[...]
    eig3 = eig2 + fz

    # ---- decoder -> per-head eigenvalue multipliers ----
    newe_ref[...] = _dot(eig3, wdec_ref[...]) + bdec_ref[...]


def _spec_layers_kernel(u_ref, h_ref, e_ref, w_ref, o_ref):
    nlayer = w_ref.shape[0]
    nheads = e_ref.shape[1]
    u = u_ref[...]                    # (N, N) bf16 eigenvectors
    new_e = e_ref[...]                # (N, nheads)
    h = h_ref[...]                    # (N, C)
    for l in range(nlayer):
        w = w_ref[l]                  # (nheads + 1, C)
        # u^T @ h without materializing the transpose
        utx = lax.dot_general(u, h.astype(_BF16), (((0,), (0,)), ((), ())),
                              preferred_element_type=_F32)        # (N, C)
        # fold all heads and their (1, C) combine weights into ONE u @ (...) matmul
        m = jnp.zeros_like(utx)
        for i in range(nheads):
            m = m + new_e[:, i:i + 1] * utx * w[i + 1:i + 2, :]
        h = h * w[0:1, :] + jnp.dot(u, m.astype(_BF16), preferred_element_type=_F32)
    o_ref[...] = h


# --------------------------- pallas_call wrappers --------------------------

def encode(x, eeig, fft_feat, p):
    N = x.shape[0]
    nclass = p["feat_enc2_b"].shape[1]
    hidden = p["eig_w_b"].shape[1]
    args = (x, eeig, fft_feat,
            p["feat_enc1_w"], p["feat_enc1_b"], p["feat_enc2_w"], p["feat_enc2_b"],
            p["eig_w_w"], p["eig_w_b"], p["fft_w"], p["fft_b"])
    return pl.pallas_call(
        _encode_kernel,
        out_shape=(jax.ShapeDtypeStruct((N, nclass), _F32),
                   jax.ShapeDtypeStruct((N, hidden), _F32)),
        grid=(1,),
        in_specs=[_full_spec(a.shape) for a in args],
        out_specs=(_full_spec((N, nclass)), _full_spec((N, hidden))),
        compiler_params=_CPARAMS,
    )(*args)


def transformer_decode(eig, p):
    N, _ = eig.shape
    nheads = p["dec_b"].shape[1]
    vmem_args = (eig,
                 p["mha_norm_g"], p["mha_norm_b"],
                 p["w12"], p["b12"],
                 p["w_qkv"],
                 p["attn_out_w"], p["attn_out_b"],
                 p["norm2_g"], p["norm2_b"],
                 p["mlp1_w"], p["mlp1_b"], p["mlp2_w"], p["mlp2_b"],
                 p["ffn_norm_g"], p["ffn_norm_b"],
                 p["ffn1_w"], p["ffn1_b"], p["ffn2_w"], p["ffn2_b"],
                 p["dec_w"], p["dec_b"])
    return pl.pallas_call(
        _transformer_kernel,
        out_shape=jax.ShapeDtypeStruct((N, nheads), _F32),
        grid=(1,),
        in_specs=[_full_spec(a.shape) for a in vmem_args] + [_SMEM_SPEC, _SMEM_SPEC],
        out_specs=_full_spec((N, nheads)),
        compiler_params=_CPARAMS,
    )(*vmem_args, p["conv_w"], p["conv_b"])


def spec_propagate(u_bf16, h, new_e, spec_w):
    N, C = h.shape
    args = (u_bf16, h, new_e, spec_w)
    return pl.pallas_call(
        _spec_layers_kernel,
        out_shape=jax.ShapeDtypeStruct((N, C), _F32),
        grid=(1,),
        in_specs=[_full_spec(a.shape) for a in args],
        out_specs=_full_spec((N, C)),
        compiler_params=_CPARAMS,
    )(*args)


# ----------------------------- parameter init -----------------------------

def _init_linear(key, fan_in, fan_out, bias=True):
    k1, k2 = jax.random.split(key)
    bound = 1.0 / math.sqrt(fan_in)
    w = jax.random.uniform(k1, (fan_in, fan_out), minval=-bound, maxval=bound, dtype=_F32)
    if bias:
        b = jax.random.uniform(k2, (1, fan_out), minval=-bound, maxval=bound, dtype=_F32)
    else:
        b = jnp.zeros((1, fan_out), _F32)
    return w, b


def init_specformer_params(key, nclass, nfeat, hidden, nheads, nlayer):
    keys = jax.random.split(key, 24)
    ki = iter(keys)
    p = {}

    def bf(w):  # matmul weights stored as bf16 (halves DMA; f32 accumulation in-kernel)
        return w.astype(_BF16)

    w, b = _init_linear(next(ki), nfeat, hidden);      p["feat_enc1_w"], p["feat_enc1_b"] = bf(w), b
    w, b = _init_linear(next(ki), hidden, nclass);     p["feat_enc2_w"], p["feat_enc2_b"] = bf(w), b
    w, b = _init_linear(next(ki), hidden + 1, hidden); p["eig_w_w"], p["eig_w_b"] = bf(w), b
    w, b = _init_linear(next(ki), 2, hidden);          p["fft_w"], p["fft_b"] = bf(w), b
    w, b = _init_linear(next(ki), hidden, nheads);     p["dec_w"], p["dec_b"] = bf(w), b

    p["mha_norm_g"] = jnp.ones((1, hidden), _F32); p["mha_norm_b"] = jnp.zeros((1, hidden), _F32)
    p["ffn_norm_g"] = jnp.ones((1, hidden), _F32); p["ffn_norm_b"] = jnp.zeros((1, hidden), _F32)
    p["norm2_g"] = jnp.ones((1, hidden), _F32);    p["norm2_b"] = jnp.zeros((1, hidden), _F32)

    # LinearAttention: fuse linear1 || linear2 and q || k || v into single matmuls
    w1, b1 = _init_linear(next(ki), hidden, hidden)
    w2, b2 = _init_linear(next(ki), hidden, hidden)
    p["w12"] = bf(jnp.concatenate([w1, w2], axis=1))
    p["b12"] = jnp.concatenate([b1, b2], axis=1)
    wq, _ = _init_linear(next(ki), hidden, hidden, bias=False)
    wk, _ = _init_linear(next(ki), hidden, hidden, bias=False)
    wv, _ = _init_linear(next(ki), hidden, hidden, bias=False)
    p["w_qkv"] = bf(jnp.concatenate([wq, wk, wv], axis=1))
    w, b = _init_linear(next(ki), hidden, hidden);     p["attn_out_w"], p["attn_out_b"] = bf(w), b

    kc1, kc2 = jax.random.split(next(ki))
    cb = 1.0 / math.sqrt(9.0)
    p["conv_w"] = jax.random.uniform(kc1, (3, 3), minval=-cb, maxval=cb, dtype=_F32)
    p["conv_b"] = jax.random.uniform(kc2, (1,), minval=-cb, maxval=cb, dtype=_F32)

    w, b = _init_linear(next(ki), hidden, hidden * 2); p["mlp1_w"], p["mlp1_b"] = bf(w), b
    w, b = _init_linear(next(ki), hidden * 2, hidden); p["mlp2_w"], p["mlp2_b"] = bf(w), b
    w, b = _init_linear(next(ki), hidden, hidden);     p["ffn1_w"], p["ffn1_b"] = bf(w), b
    w, b = _init_linear(next(ki), hidden, hidden);     p["ffn2_w"], p["ffn2_b"] = bf(w), b

    # SpecLayer weights (norm='none' -> ones), stacked over layers
    p["spec_w"] = jnp.ones((nlayer, nheads + 1, nclass), _F32)
    return p


# ----------------------------- forward (glue) ------------------------------

def specformer_forward(e, u, x, p, hidden, nheads, nlayer):
    del nheads, nlayer  # derived from parameter shapes inside the kernels
    # all dropouts have p=0 -> identity (eval semantics)

    # SineEncoding features (sin/cos kept in plain JAX)
    ee = e * 100.0
    div = jnp.exp(jnp.arange(0, hidden, 2, dtype=_F32) * (-math.log(10000.0) / hidden))
    pe = ee[:, None] * div[None, :]
    eeig = jnp.concatenate([e[:, None], jnp.sin(pe), jnp.cos(pe)], axis=1)

    # TODO(synk): the FFT itself has no Pallas equivalent; computed in plain JAX.
    X = jnp.fft.fft(e)
    fft_feat = jnp.stack([jnp.abs(X), jnp.angle(X)], axis=1).astype(_F32)

    h, eig = encode(x, eeig, fft_feat, p)          # kernel 1
    new_e = transformer_decode(eig, p)             # kernel 2
    h = spec_propagate(u.astype(_BF16), h, new_e, p["spec_w"])   # kernel 3
    return h


# --------------------------------- main ------------------------------------

if __name__ == "__main__":
    N, nfeat, hidden, nclass, nheads, nlayer = 8, 16, 32, 4, 1, 1

    key = jax.random.PRNGKey(0)
    kp, ke, ku, kx = jax.random.split(key, 4)
    params = init_specformer_params(kp, nclass, nfeat, hidden, nheads, nlayer)

    e = jax.random.uniform(ke, (N,), dtype=_F32)                      # eigenvalues
    u = jax.random.normal(ku, (N, N), dtype=_F32) / math.sqrt(N)      # eigenvectors
    x = jax.random.normal(kx, (N, nfeat), dtype=_F32)                 # node features

    fwd = jax.jit(functools.partial(specformer_forward,
                                    hidden=hidden, nheads=nheads, nlayer=nlayer))
    out = fwd(e, u, x, params)
    jax.block_until_ready(out)
    assert out.shape == (N, nclass)
    print("KERNEL_OK")
</pallas_src>

<mosaic_0001>
module attributes {stable_mosaic.version = 11 : i64} {
  func.func @_encode_kernel(%arg0: i32, %arg1: memref<8x16xf32, #tpu.memory_space<vmem>>, %arg2: memref<8x33xf32, #tpu.memory_space<vmem>>, %arg3: memref<8x2xf32, #tpu.memory_space<vmem>>, %arg4: memref<16x32xbf16, #tpu.memory_space<vmem>>, %arg5: memref<1x32xf32, #tpu.memory_space<vmem>>, %arg6: memref<32x4xbf16, #tpu.memory_space<vmem>>, %arg7: memref<1x4xf32, #tpu.memory_space<vmem>>, %arg8: memref<33x32xbf16, #tpu.memory_space<vmem>>, %arg9: memref<1x32xf32, #tpu.memory_space<vmem>>, %arg10: memref<2x32xbf16, #tpu.memory_space<vmem>>, %arg11: memref<1x32xf32, #tpu.memory_space<vmem>>, %arg12: memref<8x4xf32, #tpu.memory_space<vmem>>, %arg13: memref<8x32xf32, #tpu.memory_space<vmem>>) attributes {dimension_semantics = [#tpu.dimension_semantics<arbitrary>], iteration_bounds = array<i64: 1>, scalar_prefetch = 0 : i64, scratch_operands = 0 : i64, tpu.core_type = #tpu.core_type<tc>, window_params = [{pipeline_mode = #tpu.pipeline_mode<synchronous>, transform_indices = @transform_0, window_bounds = array<i64: 8, 16>}, {pipeline_mode = #tpu.pipeline_mode<synchronous>, transform_indices = @transform_1, window_bounds = array<i64: 8, 33>}, {pipeline_mode = #tpu.pipeline_mode<synchronous>, transform_indices = @transform_2, window_bounds = array<i64: 8, 2>}, {pipeline_mode = #tpu.pipeline_mode<synchronous>, transform_indices = @transform_3, window_bounds = array<i64: 16, 32>}, {pipeline_mode = #tpu.pipeline_mode<synchronous>, transform_indices = @transform_4, window_bounds = array<i64: 1, 32>}, {pipeline_mode = #tpu.pipeline_mode<synchronous>, transform_indices = @transform_5, window_bounds = array<i64: 32, 4>}, {pipeline_mode = #tpu.pipeline_mode<synchronous>, transform_indices = @transform_6, window_bounds = array<i64: 1, 4>}, {pipeline_mode = #tpu.pipeline_mode<synchronous>, transform_indices = @transform_7, window_bounds = array<i64: 33, 32>}, {pipeline_mode = #tpu.pipeline_mode<synchronous>, transform_indices = @transform_8, window_bounds = array<i64: 1, 32>}, {pipeline_mode = #tpu.pipeline_mode<synchronous>, transform_indices = @transform_9, window_bounds = array<i64: 2, 32>}, {pipeline_mode = #tpu.pipeline_mode<synchronous>, transform_indices = @transform_10, window_bounds = array<i64: 1, 32>}, {pipeline_mode = #tpu.pipeline_mode<synchronous>, transform_indices = @transform_11, window_bounds = array<i64: 8, 4>}, {pipeline_mode = #tpu.pipeline_mode<synchronous>, transform_indices = @transform_12, window_bounds = array<i64: 8, 32>}]} {
    %c0 = arith.constant 0 : index
    %c0_0 = arith.constant 0 : index
    %0 = vector.load %arg1[%c0, %c0_0] : memref<8x16xf32, #tpu.memory_space<vmem>>, vector<8x16xf32>
    %c0_1 = arith.constant 0 : index
    %c0_2 = arith.constant 0 : index
    %1 = vector.load %arg4[%c0_1, %c0_2] : memref<16x32xbf16, #tpu.memory_space<vmem>>, vector<16x32xbf16>
    %2 = arith.truncf %0 : vector<8x16xf32> to vector<8x16xbf16>
    %cst = arith.constant dense<0.000000e+00> : vector<8x32xf32>
    %3 = tpu.matmul %2, %1, %cst {dimension_numbers = #tpu.dot_dimension_numbers<[1], [0], [0], [1], [0, 0, 1, 1], [], []>} : vector<8x16xbf16>, vector<16x32xbf16>, vector<8x32xf32> -> vector<8x32xf32>
    %c0_3 = arith.constant 0 : index
    %c0_4 = arith.constant 0 : index
    %4 = vector.load %arg5[%c0_3, %c0_4] : memref<1x32xf32, #tpu.memory_space<vmem>>, vector<1x32xf32>
    %5 = vector.broadcast %4 : vector<1x32xf32> to vector<8x32xf32>
    %6 = arith.addf %3, %5 : vector<8x32xf32>
    %cst_5 = arith.constant 0.000000e+00 : f32
    %7 = vector.broadcast %cst_5 : f32 to vector<8x32xf32>
    %8 = arith.maximumf %6, %7 : vector<8x32xf32>
    %c0_6 = arith.constant 0 : index
    %c0_7 = arith.constant 0 : index
    %9 = vector.load %arg6[%c0_6, %c0_7] : memref<32x4xbf16, #tpu.memory_space<vmem>>, vector<32x4xbf16>
    %10 = arith.truncf %8 : vector<8x32xf32> to vector<8x32xbf16>
    %cst_8 = arith.constant dense<0.000000e+00> : vector<8x4xf32>
    %11 = tpu.matmul %10, %9, %cst_8 {dimension_numbers = #tpu.dot_dimension_numbers<[1], [0], [0], [1], [0, 0, 1, 1], [], []>} : vector<8x32xbf16>, vector<32x4xbf16>, vector<8x4xf32> -> vector<8x4xf32>
    %c0_9 = arith.constant 0 : index
    %c0_10 = arith.constant 0 : index
    %12 = vector.load %arg7[%c0_9, %c0_10] : memref<1x4xf32, #tpu.memory_space<vmem>>, vector<1x4xf32>
    %13 = vector.broadcast %12 : vector<1x4xf32> to vector<8x4xf32>
    %14 = arith.addf %11, %13 : vector<8x4xf32>
    %c0_11 = arith.constant 0 : index
    %c0_12 = arith.constant 0 : index
    %15 = vector.load %arg12[%c0_11, %c0_12] : memref<8x4xf32, #tpu.memory_space<vmem>>, vector<8x4xf32>
    tpu.vector_store %arg12[%c0_11, %c0_12], %14 {strides = array<i32>} : memref<8x4xf32, #tpu.memory_space<vmem>>, vector<8x4xf32>,
    %c0_13 = arith.constant 0 : index
    %c0_14 = arith.constant 0 : index
    %16 = vector.load %arg2[%c0_13, %c0_14] : memref<8x33xf32, #tpu.memory_space<vmem>>, vector<8x33xf32>
    %c0_15 = arith.constant 0 : index
    %c0_16 = arith.constant 0 : index
    %17 = vector.load %arg8[%c0_15, %c0_16] : memref<33x32xbf16, #tpu.memory_space<vmem>>, vector<33x32xbf16>
    %18 = arith.truncf %16 : vector<8x33xf32> to vector<8x33xbf16>
    %cst_17 = arith.constant dense<0.000000e+00> : vector<8x32xf32>
    %19 = tpu.matmul %18, %17, %cst_17 {dimension_numbers = #tpu.dot_dimension_numbers<[1], [0], [0], [1], [0, 0, 1, 1], [], []>} : vector<8x33xbf16>, vector<33x32xbf16>, vector<8x32xf32> -> vector<8x32xf32>
    %c0_18 = arith.constant 0 : index
    %c0_19 = arith.constant 0 : index
    %20 = vector.load %arg9[%c0_18, %c0_19] : memref<1x32xf32, #tpu.memory_space<vmem>>, vector<1x32xf32>
    %21 = vector.broadcast %20 : vector<1x32xf32> to vector<8x32xf32>
    %22 = arith.addf %19, %21 : vector<8x32xf32>
    %c0_20 = arith.constant 0 : index
    %c0_21 = arith.constant 0 : index
    %23 = vector.load %arg3[%c0_20, %c0_21] : memref<8x2xf32, #tpu.memory_space<vmem>>, vector<8x2xf32>
    %c0_22 = arith.constant 0 : index
    %c0_23 = arith.constant 0 : index
    %24 = vector.load %arg10[%c0_22, %c0_23] : memref<2x32xbf16, #tpu.memory_space<vmem>>, vector<2x32xbf16>
    %25 = arith.truncf %23 : vector<8x2xf32> to vector<8x2xbf16>
    %cst_24 = arith.constant dense<0.000000e+00> : vector<8x32xf32>
    %26 = tpu.matmul %25, %24, %cst_24 {dimension_numbers = #tpu.dot_dimension_numbers<[1], [0], [0], [1], [0, 0, 1, 1], [], []>} : vector<8x2xbf16>, vector<2x32xbf16>, vector<8x32xf32> -> vector<8x32xf32>
    %27 = arith.addf %22, %26 : vector<8x32xf32>
    %c0_25 = arith.constant 0 : index
    %c0_26 = arith.constant 0 : index
    %28 = vector.load %arg11[%c0_25, %c0_26] : memref<1x32xf32, #tpu.memory_space<vmem>>, vector<1x32xf32>
    %29 = vector.broadcast %28 : vector<1x32xf32> to vector<8x32xf32>
    %30 = arith.addf %27, %29 : vector<8x32xf32>
    %c0_27 = arith.constant 0 : index
    %c0_28 = arith.constant 0 : index
    %31 = vector.load %arg13[%c0_27, %c0_28] : memref<8x32xf32, #tpu.memory_space<vmem>>, vector<8x32xf32>
    tpu.vector_store %arg13[%c0_27, %c0_28], %30 {strides = array<i32>} : memref<8x32xf32, #tpu.memory_space<vmem>>, vector<8x32xf32>,
    return
  }
  func.func @transform_0(%arg0: i32) -> (i32, i32) {
    %c0_i32 = arith.constant 0 : i32
    %c0_i32_0 = arith.constant 0 : i32
    %c0_i32_1 = arith.constant 0 : i32
    return %c0_i32, %c0_i32_0 : i32, i32
  }
  func.func @transform_1(%arg0: i32) -> (i32, i32) {
    %c0_i32 = arith.constant 0 : i32
    %c0_i32_0 = arith.constant 0 : i32
    %c0_i32_1 = arith.constant 0 : i32
    return %c0_i32, %c0_i32_0 : i32, i32
  }
  func.func @transform_2(%arg0: i32) -> (i32, i32) {
    %c0_i32 = arith.constant 0 : i32
    %c0_i32_0 = arith.constant 0 : i32
    %c0_i32_1 = arith.constant 0 : i32
    return %c0_i32, %c0_i32_0 : i32, i32
  }
  func.func @transform_3(%arg0: i32) -> (i32, i32) {
    %c0_i32 = arith.constant 0 : i32
    %c0_i32_0 = arith.constant 0 : i32
    %c0_i32_1 = arith.constant 0 : i32
    return %c0_i32, %c0_i32_0 : i32, i32
  }
  func.func @transform_4(%arg0: i32) -> (i32, i32) {
    %c0_i32 = arith.constant 0 : i32
    %c0_i32_0 = arith.constant 0 : i32
    %c0_i32_1 = arith.constant 0 : i32
    return %c0_i32, %c0_i32_0 : i32, i32
  }
  func.func @transform_5(%arg0: i32) -> (i32, i32) {
    %c0_i32 = arith.constant 0 : i32
    %c0_i32_0 = arith.constant 0 : i32
    %c0_i32_1 = arith.constant 0 : i32
    return %c0_i32, %c0_i32_0 : i32, i32
  }
  func.func @transform_6(%arg0: i32) -> (i32, i32) {
    %c0_i32 = arith.constant 0 : i32
    %c0_i32_0 = arith.constant 0 : i32
    %c0_i32_1 = arith.constant 0 : i32
    return %c0_i32, %c0_i32_0 : i32, i32
  }
  func.func @transform_7(%arg0: i32) -> (i32, i32) {
    %c0_i32 = arith.constant 0 : i32
    %c0_i32_0 = arith.constant 0 : i32
    %c0_i32_1 = arith.constant 0 : i32
    return %c0_i32, %c0_i32_0 : i32, i32
  }
  func.func @transform_8(%arg0: i32) -> (i32, i32) {
    %c0_i32 = arith.constant 0 : i32
    %c0_i32_0 = arith.constant 0 : i32
    %c0_i32_1 = arith.constant 0 : i32
    return %c0_i32, %c0_i32_0 : i32, i32
  }
  func.func @transform_9(%arg0: i32) -> (i32, i32) {
    %c0_i32 = arith.constant 0 : i32
    %c0_i32_0 = arith.constant 0 : i32
    %c0_i32_1 = arith.constant 0 : i32
    return %c0_i32, %c0_i32_0 : i32, i32
  }
  func.func @transform_10(%arg0: i32) -> (i32, i32) {
    %c0_i32 = arith.constant 0 : i32
    %c0_i32_0 = arith.constant 0 : i32
    %c0_i32_1 = arith.constant 0 : i32
    return %c0_i32, %c0_i32_0 : i32, i32
  }
  func.func @transform_11(%arg0: i32) -> (i32, i32) {
    %c0_i32 = arith.constant 0 : i32
    %c0_i32_0 = arith.constant 0 : i32
    %c0_i32_1 = arith.constant 0 : i32
    return %c0_i32, %c0_i32_0 : i32, i32
  }
  func.func @transform_12(%arg0: i32) -> (i32, i32) {
    %c0_i32 = arith.constant 0 : i32
    %c0_i32_0 = arith.constant 0 : i32
    %c0_i32_1 = arith.constant 0 : i32
    return %c0_i32, %c0_i32_0 : i32, i32
  }
}

module attributes {stable_mosaic.version = 11 : i64} {
  func.func @_spec_layers_kernel(%arg0: i32, %arg1: memref<8x8xbf16, #tpu.memory_space<vmem>>, %arg2: memref<8x4xf32, #tpu.memory_space<vmem>>, %arg3: memref<8x1xf32, #tpu.memory_space<vmem>>, %arg4: memref<1x2x4xf32, #tpu.memory_space<vmem>>, %arg5: memref<8x4xf32, #tpu.memory_space<vmem>>) attributes {dimension_semantics = [#tpu.dimension_semantics<arbitrary>], iteration_bounds = array<i64: 1>, scalar_prefetch = 0 : i64, scratch_operands = 0 : i64, tpu.core_type = #tpu.core_type<tc>, window_params = [{pipeline_mode = #tpu.pipeline_mode<synchronous>, transform_indices = @transform_0, window_bounds = array<i64: 8, 8>}, {pipeline_mode = #tpu.pipeline_mode<synchronous>, transform_indices = @transform_1, window_bounds = array<i64: 8, 4>}, {pipeline_mode = #tpu.pipeline_mode<synchronous>, transform_indices = @transform_2, window_bounds = array<i64: 8, 1>}, {pipeline_mode = #tpu.pipeline_mode<synchronous>, transform_indices = @transform_3, window_bounds = array<i64: 1, 2, 4>}, {pipeline_mode = #tpu.pipeline_mode<synchronous>, transform_indices = @transform_4, window_bounds = array<i64: 8, 4>}]} {
    %c0 = arith.constant 0 : index
    %c0_0 = arith.constant 0 : index
    %0 = vector.load %arg1[%c0, %c0_0] : memref<8x8xbf16, #tpu.memory_space<vmem>>, vector<8x8xbf16>
    %c0_1 = arith.constant 0 : index
    %c0_2 = arith.constant 0 : index
    %1 = vector.load %arg3[%c0_1, %c0_2] : memref<8x1xf32, #tpu.memory_space<vmem>>, vector<8x1xf32>
    %c0_3 = arith.constant 0 : index
    %c0_4 = arith.constant 0 : index
    %2 = vector.load %arg2[%c0_3, %c0_4] : memref<8x4xf32, #tpu.memory_space<vmem>>, vector<8x4xf32>
    %c0_5 = arith.constant 0 : index
    %c0_6 = arith.constant 0 : index
    %c0_7 = arith.constant 0 : index
    %3 = vector.load %arg4[%c0_5, %c0_6, %c0_7] : memref<1x2x4xf32, #tpu.memory_space<vmem>>, vector<1x2x4xf32>
    %4 = vector.shape_cast %3 : vector<1x2x4xf32> to vector<2x4xf32>
    %5 = arith.truncf %2 : vector<8x4xf32> to vector<8x4xbf16>
    %cst = arith.constant dense<0.000000e+00> : vector<8x4xf32>
    %6 = tpu.matmul %0, %5, %cst {dimension_numbers = #tpu.dot_dimension_numbers<[0], [0], [1], [1], [0, 1, 1, 1], [], []>} : vector<8x8xbf16>, vector<8x4xbf16>, vector<8x4xf32> -> vector<8x4xf32>
    %cst_8 = arith.constant 0.000000e+00 : f32
    %7 = vector.broadcast %cst_8 : f32 to vector<8x4xf32>
    %8 = vector.broadcast %1 : vector<8x1xf32> to vector<8x4xf32>
    %9 = arith.mulf %8, %6 : vector<8x4xf32>
    %10 = vector.extract_strided_slice %4 {offsets = [1, 0], sizes = [1, 4], strides = [1, 1]} : vector<2x4xf32> to vector<1x4xf32>
    %11 = vector.broadcast %10 : vector<1x4xf32> to vector<8x4xf32>
    %12 = arith.mulf %9, %11 : vector<8x4xf32>
    %13 = arith.addf %7, %12 : vector<8x4xf32>
    %14 = vector.extract_strided_slice %4 {offsets = [0, 0], sizes = [1, 4], strides = [1, 1]} : vector<2x4xf32> to vector<1x4xf32>
    %15 = vector.broadcast %14 : vector<1x4xf32> to vector<8x4xf32>
    %16 = arith.mulf %2, %15 : vector<8x4xf32>
    %17 = arith.truncf %13 : vector<8x4xf32> to vector<8x4xbf16>
    %cst_9 = arith.constant dense<0.000000e+00> : vector<8x4xf32>
    %18 = tpu.matmul %0, %17, %cst_9 {dimension_numbers = #tpu.dot_dimension_numbers<[1], [0], [0], [1], [0, 0, 1, 1], [], []>} : vector<8x8xbf16>, vector<8x4xbf16>, vector<8x4xf32> -> vector<8x4xf32>
    %19 = arith.addf %16, %18 : vector<8x4xf32>
    %c0_10 = arith.constant 0 : index
    %c0_11 = arith.constant 0 : index
    %20 = vector.load %arg5[%c0_10, %c0_11] : memref<8x4xf32, #tpu.memory_space<vmem>>, vector<8x4xf32>
    tpu.vector_store %arg5[%c0_10, %c0_11], %19 {strides = array<i32>} : memref<8x4xf32, #tpu.memory_space<vmem>>, vector<8x4xf32>,
    return
  }
  func.func @transform_0(%arg0: i32) -> (i32, i32) {
    %c0_i32 = arith.constant 0 : i32
    %c0_i32_0 = arith.constant 0 : i32
    %c0_i32_1 = arith.constant 0 : i32
    return %c0_i32, %c0_i32_0 : i32, i32
  }
  func.func @transform_1(%arg0: i32) -> (i32, i32) {
    %c0_i32 = arith.constant 0 : i32
    %c0_i32_0 = arith.constant 0 : i32
    %c0_i32_1 = arith.constant 0 : i32
    return %c0_i32, %c0_i32_0 : i32, i32
  }
  func.func @transform_2(%arg0: i32) -> (i32, i32) {
    %c0_i32 = arith.constant 0 : i32
    %c0_i32_0 = arith.constant 0 : i32
    %c0_i32_1 = arith.constant 0 : i32
    return %c0_i32, %c0_i32_0 : i32, i32
  }
  func.func @transform_3(%arg0: i32) -> (i32, i32, i32) {
    %c0_i32 = arith.constant 0 : i32
    %c0_i32_0 = arith.constant 0 : i32
    %c0_i32_1 = arith.constant 0 : i32
    %c0_i32_2 = arith.constant 0 : i32
    return %c0_i32, %c0_i32_0, %c0_i32_1 : i32, i32, i32
  }
  func.func @transform_4(%arg0: i32) -> (i32, i32) {
    %c0_i32 = arith.constant 0 : i32
    %c0_i32_0 = arith.constant 0 : i32
    %c0_i32_1 = arith.constant 0 : i32
    return %c0_i32, %c0_i32_0 : i32, i32
  }
}

module attributes {stable_mosaic.version = 11 : i64} {
  func.func @_transformer_kernel(%arg0: i32, %arg1: memref<8x32xf32, #tpu.memory_space<vmem>>, %arg2: memref<1x32xf32, #tpu.memory_space<vmem>>, %arg3: memref<1x32xf32, #tpu.memory_space<vmem>>, %arg4: memref<32x64xbf16, #tpu.memory_space<vmem>>, %arg5: memref<1x64xf32, #tpu.memory_space<vmem>>, %arg6: memref<32x96xbf16, #tpu.memory_space<vmem>>, %arg7: memref<32x32xbf16, #tpu.memory_space<vmem>>, %arg8: memref<1x32xf32, #tpu.memory_space<vmem>>, %arg9: memref<1x32xf32, #tpu.memory_space<vmem>>, %arg10: memref<1x32xf32, #tpu.memory_space<vmem>>, %arg11: memref<32x64xbf16, #tpu.memory_space<vmem>>, %arg12: memref<1x64xf32, #tpu.memory_space<vmem>>, %arg13: memref<64x32xbf16, #tpu.memory_space<vmem>>, %arg14: memref<1x32xf32, #tpu.memory_space<vmem>>, %arg15: memref<1x32xf32, #tpu.memory_space<vmem>>, %arg16: memref<1x32xf32, #tpu.memory_space<vmem>>, %arg17: memref<32x32xbf16, #tpu.memory_space<vmem>>, %arg18: memref<1x32xf32, #tpu.memory_space<vmem>>, %arg19: memref<32x32xbf16, #tpu.memory_space<vmem>>, %arg20: memref<1x32xf32, #tpu.memory_space<vmem>>, %arg21: memref<32x1xbf16, #tpu.memory_space<vmem>>, %arg22: memref<1x1xf32, #tpu.memory_space<vmem>>, %arg23: memref<3x3xf32, #tpu.memory_space<smem>>, %arg24: memref<1xf32, #tpu.memory_space<smem>>, %arg25: memref<8x1xf32, #tpu.memory_space<vmem>>) attributes {dimension_semantics = [#tpu.dimension_semantics<arbitrary>], iteration_bounds = array<i64: 1>, scalar_prefetch = 0 : i64, scratch_operands = 0 : i64, tpu.core_type = #tpu.core_type<tc>, window_params = [{pipeline_mode = #tpu.pipeline_mode<synchronous>, transform_indices = @transform_0, window_bounds = array<i64: 8, 32>}, {pipeline_mode = #tpu.pipeline_mode<synchronous>, transform_indices = @transform_1, window_bounds = array<i64: 1, 32>}, {pipeline_mode = #tpu.pipeline_mode<synchronous>, transform_indices = @transform_2, window_bounds = array<i64: 1, 32>}, {pipeline_mode = #tpu.pipeline_mode<synchronous>, transform_indices = @transform_3, window_bounds = array<i64: 32, 64>}, {pipeline_mode = #tpu.pipeline_mode<synchronous>, transform_indices = @transform_4, window_bounds = array<i64: 1, 64>}, {pipeline_mode = #tpu.pipeline_mode<synchronous>, transform_indices = @transform_5, window_bounds = array<i64: 32, 96>}, {pipeline_mode = #tpu.pipeline_mode<synchronous>, transform_indices = @transform_6, window_bounds = array<i64: 32, 32>}, {pipeline_mode = #tpu.pipeline_mode<synchronous>, transform_indices = @transform_7, window_bounds = array<i64: 1, 32>}, {pipeline_mode = #tpu.pipeline_mode<synchronous>, transform_indices = @transform_8, window_bounds = array<i64: 1, 32>}, {pipeline_mode = #tpu.pipeline_mode<synchronous>, transform_indices = @transform_9, window_bounds = array<i64: 1, 32>}, {pipeline_mode = #tpu.pipeline_mode<synchronous>, transform_indices = @transform_10, window_bounds = array<i64: 32, 64>}, {pipeline_mode = #tpu.pipeline_mode<synchronous>, transform_indices = @transform_11, window_bounds = array<i64: 1, 64>}, {pipeline_mode = #tpu.pipeline_mode<synchronous>, transform_indices = @transform_12, window_bounds = array<i64: 64, 32>}, {pipeline_mode = #tpu.pipeline_mode<synchronous>, transform_indices = @transform_13, window_bounds = array<i64: 1, 32>}, {pipeline_mode = #tpu.pipeline_mode<synchronous>, transform_indices = @transform_14, window_bounds = array<i64: 1, 32>}, {pipeline_mode = #tpu.pipeline_mode<synchronous>, transform_indices = @transform_15, window_bounds = array<i64: 1, 32>}, {pipeline_mode = #tpu.pipeline_mode<synchronous>, transform_indices = @transform_16, window_bounds = array<i64: 32, 32>}, {pipeline_mode = #tpu.pipeline_mode<synchronous>, transform_indices = @transform_17, window_bounds = array<i64: 1, 32>}, {pipeline_mode = #tpu.pipeline_mode<synchronous>, transform_indices = @transform_18, window_bounds = array<i64: 32, 32>}, {pipeline_mode = #tpu.pipeline_mode<synchronous>, transform_indices = @transform_19, window_bounds = array<i64: 1, 32>}, {pipeline_mode = #tpu.pipeline_mode<synchronous>, transform_indices = @transform_20, window_bounds = array<i64: 32, 1>}, {pipeline_mode = #tpu.pipeline_mode<synchronous>, transform_indices = @transform_21, window_bounds = array<i64: 1, 1>}, {transform_indices = @transform_22, window_bounds = array<i64: 3, 3>}, {transform_indices = @transform_23, window_bounds = array<i64: 1>}, {pipeline_mode = #tpu.pipeline_mode<synchronous>, transform_indices = @transform_24, window_bounds = array<i64: 8, 1>}]} {
    %c0 = arith.constant 0 : index
    %c0_0 = arith.constant 0 : index
    %0 = vector.load %arg1[%c0, %c0_0] : memref<8x32xf32, #tpu.memory_space<vmem>>, vector<8x32xf32>
    %c0_1 = arith.constant 0 : index
    %c0_2 = arith.constant 0 : index
    %1 = vector.load %arg2[%c0_1, %c0_2] : memref<1x32xf32, #tpu.memory_space<vmem>>, vector<1x32xf32>
    %c0_3 = arith.constant 0 : index
    %c0_4 = arith.constant 0 : index
    %2 = vector.load %arg3[%c0_3, %c0_4] : memref<1x32xf32, #tpu.memory_space<vmem>>, vector<1x32xf32>
    %cst = arith.constant dense<0.000000e+00> : vector<8xf32>
    %3 = vector.multi_reduction <add>, %0, %cst [1] : vector<8x32xf32> to vector<8xf32>
    %4 = vector.shape_cast %3 : vector<8xf32> to vector<8x1xf32>
    %cst_5 = arith.constant 3.200000e+01 : f32
    %5 = vector.broadcast %cst_5 : f32 to vector<8x1xf32>
    %6 = arith.divf %4, %5 : vector<8x1xf32>
    %7 = vector.broadcast %6 : vector<8x1xf32> to vector<8x32xf32>
    %8 = arith.subf %0, %7 : vector<8x32xf32>
    %9 = arith.mulf %8, %8 : vector<8x32xf32>
    %cst_6 = arith.constant dense<0.000000e+00> : vector<8xf32>
    %10 = vector.multi_reduction <add>, %9, %cst_6 [1] : vector<8x32xf32> to vector<8xf32>
    %11 = vector.shape_cast %10 : vector<8xf32> to vector<8x1xf32>
    %cst_7 = arith.constant 3.200000e+01 : f32
    %12 = vector.broadcast %cst_7 : f32 to vector<8x1xf32>
    %13 = arith.divf %11, %12 : vector<8x1xf32>
    %cst_8 = arith.constant 9.99999974E-6 : f32
    %14 = vector.broadcast %cst_8 : f32 to vector<8x1xf32>
    %15 = arith.addf %13, %14 : vector<8x1xf32>
    %16 = math.rsqrt %15 : vector<8x1xf32>
    %17 = vector.broadcast %16 : vector<8x1xf32> to vector<8x32xf32>
    %18 = arith.mulf %8, %17 : vector<8x32xf32>
    %19 = vector.broadcast %1 : vector<1x32xf32> to vector<8x32xf32>
    %20 = arith.mulf %18, %19 : vector<8x32xf32>
    %21 = vector.broadcast %2 : vector<1x32xf32> to vector<8x32xf32>
    %22 = arith.addf %20, %21 : vector<8x32xf32>
    %c0_9 = arith.constant 0 : index
    %c0_10 = arith.constant 0 : index
    %23 = vector.load %arg4[%c0_9, %c0_10] : memref<32x64xbf16, #tpu.memory_space<vmem>>, vector<32x64xbf16>
    %24 = arith.truncf %22 : vector<8x32xf32> to vector<8x32xbf16>
    %cst_11 = arith.constant dense<0.000000e+00> : vector<8x64xf32>
    %25 = tpu.matmul %24, %23, %cst_11 {dimension_numbers = #tpu.dot_dimension_numbers<[1], [0], [0], [1], [0, 0, 1, 1], [], []>} : vector<8x32xbf16>, vector<32x64xbf16>, vector<8x64xf32> -> vector<8x64xf32>
    %c0_12 = arith.constant 0 : index
    %c0_13 = arith.constant 0 : index
    %26 = vector.load %arg5[%c0_12, %c0_13] : memref<1x64xf32, #tpu.memory_space<vmem>>, vector<1x64xf32>
    %27 = vector.broadcast %26 : vector<1x64xf32> to vector<8x64xf32>
    %28 = arith.addf %25, %27 : vector<8x64xf32>
    %29 = vector.extract_strided_slice %28 {offsets = [0, 0], sizes = [8, 32], strides = [1, 1]} : vector<8x64xf32> to vector<8x32xf32>
    %30 = vector.extract_strided_slice %28 {offsets = [0, 32], sizes = [8, 32], strides = [1, 1]} : vector<8x64xf32> to vector<8x32xf32>
    %cst_14 = arith.constant 0.000000e+00 : f32
    %31 = vector.broadcast %cst_14 : f32 to vector<8x32xf32>
    %32 = arith.subf %31, %30 : vector<8x32xf32>
    %33 = math.exp %32 : vector<8x32xf32>
    %cst_15 = arith.constant 1.000000e+00 : f32
    %34 = vector.broadcast %cst_15 : f32 to vector<8x32xf32>
    %35 = arith.addf %34, %33 : vector<8x32xf32>
    %cst_16 = arith.constant 1.000000e+00 : f32
    %36 = vector.broadcast %cst_16 : f32 to vector<8x32xf32>
    %37 = arith.divf %36, %35 : vector<8x32xf32>
    %cst_17 = arith.constant 0.000000e+00 : f32
    %38 = vector.broadcast %cst_17 : f32 to vector<8x1xf32>
    %cst_18 = arith.constant 0.000000e+00 : f32
    %39 = vector.broadcast %cst_18 : f32 to vector<1x34xf32>
    %40 = tpu.concatenate %38, %29, %38 in 1 : vector<8x1xf32>, vector<8x32xf32>, vector<8x1xf32> -> vector<8x34xf32>
    %41 = tpu.concatenate %39, %40, %39 in 0 : vector<1x34xf32>, vector<8x34xf32>, vector<1x34xf32> -> vector<10x34xf32>
    %cst_19 = arith.constant 0.000000e+00 : f32
    %42 = vector.broadcast %cst_19 : f32 to vector<8x32xf32>
    %c0_20 = arith.constant 0 : index
    %c0_21 = arith.constant 0 : index
    %43 = memref.load %arg23[%c0_20, %c0_21] : memref<3x3xf32, #tpu.memory_space<smem>>
    %44 = vector.extract_strided_slice %41 {offsets = [0, 0], sizes = [8, 32], strides = [1, 1]} : vector<10x34xf32> to vector<8x32xf32>
    %45 = vector.broadcast %43 : f32 to vector<8x32xf32>
    %46 = arith.mulf %45, %44 : vector<8x32xf32>
    %47 = arith.addf %42, %46 : vector<8x32xf32>
    %c0_22 = arith.constant 0 : index
    %c1 = arith.constant 1 : index
    %48 = memref.load %arg23[%c0_22, %c1] : memref<3x3xf32, #tpu.memory_space<smem>>
    %49 = vector.extract_strided_slice %41 {offsets = [0, 1], sizes = [8, 32], strides = [1, 1]} : vector<10x34xf32> to vector<8x32xf32>
    %50 = vector.broadcast %48 : f32 to vector<8x32xf32>
    %51 = arith.mulf %50, %49 : vector<8x32xf32>
    %52 = arith.addf %47, %51 : vector<8x32xf32>
    %c0_23 = arith.constant 0 : index
    %c2 = arith.constant 2 : index
    %53 = memref.load %arg23[%c0_23, %c2] : memref<3x3xf32, #tpu.memory_space<smem>>
    %54 = vector.extract_strided_slice %41 {offsets = [0, 2], sizes = [8, 32], strides = [1, 1]} : vector<10x34xf32> to vector<8x32xf32>
    %55 = vector.broadcast %53 : f32 to vector<8x32xf32>
    %56 = arith.mulf %55, %54 : vector<8x32xf32>
    %57 = arith.addf %52, %56 : vector<8x32xf32>
    %c1_24 = arith.constant 1 : index
    %c0_25 = arith.constant 0 : index
    %58 = memref.load %arg23[%c1_24, %c0_25] : memref<3x3xf32, #tpu.memory_space<smem>>
    %59 = vector.extract_strided_slice %41 {offsets = [1, 0], sizes = [8, 32], strides = [1, 1]} : vector<10x34xf32> to vector<8x32xf32>
    %60 = vector.broadcast %58 : f32 to vector<8x32xf32>
    %61 = arith.mulf %60, %59 : vector<8x32xf32>
    %62 = arith.addf %57, %61 : vector<8x32xf32>
    %c1_26 = arith.constant 1 : index
    %c1_27 = arith.constant 1 : index
    %63 = memref.load %arg23[%c1_26, %c1_27] : memref<3x3xf32, #tpu.memory_space<smem>>
    %64 = vector.extract_strided_slice %41 {offsets = [1, 1], sizes = [8, 32], strides = [1, 1]} : vector<10x34xf32> to vector<8x32xf32>
    %65 = vector.broadcast %63 : f32 to vector<8x32xf32>
    %66 = arith.mulf %65, %64 : vector<8x32xf32>
    %67 = arith.addf %62, %66 : vector<8x32xf32>
    %c1_28 = arith.constant 1 : index
    %c2_29 = arith.constant 2 : index
    %68 = memref.load %arg23[%c1_28, %c2_29] : memref<3x3xf32, #tpu.memory_space<smem>>
    %69 = vector.extract_strided_slice %41 {offsets = [1, 2], sizes = [8, 32], strides = [1, 1]} : vector<10x34xf32> to vector<8x32xf32>
    %70 = vector.broadcast %68 : f32 to vector<8x32xf32>
    %71 = arith.mulf %70, %69 : vector<8x32xf32>
    %72 = arith.addf %67, %71 : vector<8x32xf32>
    %c2_30 = arith.constant 2 : index
    %c0_31 = arith.constant 0 : index
    %73 = memref.load %arg23[%c2_30, %c0_31] : memref<3x3xf32, #tpu.memory_space<smem>>
    %74 = vector.extract_strided_slice %41 {offsets = [2, 0], sizes = [8, 32], strides = [1, 1]} : vector<10x34xf32> to vector<8x32xf32>
    %75 = vector.broadcast %73 : f32 to vector<8x32xf32>
    %76 = arith.mulf %75, %74 : vector<8x32xf32>
    %77 = arith.addf %72, %76 : vector<8x32xf32>
    %c2_32 = arith.constant 2 : index
    %c1_33 = arith.constant 1 : index
    %78 = memref.load %arg23[%c2_32, %c1_33] : memref<3x3xf32, #tpu.memory_space<smem>>
    %79 = vector.extract_strided_slice %41 {offsets = [2, 1], sizes = [8, 32], strides = [1, 1]} : vector<10x34xf32> to vector<8x32xf32>
    %80 = vector.broadcast %78 : f32 to vector<8x32xf32>
    %81 = arith.mulf %80, %79 : vector<8x32xf32>
    %82 = arith.addf %77, %81 : vector<8x32xf32>
    %c2_34 = arith.constant 2 : index
    %c2_35 = arith.constant 2 : index
    %83 = memref.load %arg23[%c2_34, %c2_35] : memref<3x3xf32, #tpu.memory_space<smem>>
    %84 = vector.extract_strided_slice %41 {offsets = [2, 2], sizes = [8, 32], strides = [1, 1]} : vector<10x34xf32> to vector<8x32xf32>
    %85 = vector.broadcast %83 : f32 to vector<8x32xf32>
    %86 = arith.mulf %85, %84 : vector<8x32xf32>
    %87 = arith.addf %82, %86 : vector<8x32xf32>
    %c0_36 = arith.constant 0 : index
    %88 = memref.load %arg24[%c0_36] : memref<1xf32, #tpu.memory_space<smem>>
    %89 = vector.broadcast %88 : f32 to vector<8x32xf32>
    %90 = arith.addf %87, %89 : vector<8x32xf32>
    %cst_37 = arith.constant 5.000000e-01 : f32
    %91 = vector.broadcast %cst_37 : f32 to vector<8x32xf32>
    %92 = arith.mulf %91, %90 : vector<8x32xf32>
    %cst_38 = arith.constant 0.707106769 : f32
    %93 = vector.broadcast %cst_38 : f32 to vector<8x32xf32>
    %94 = arith.mulf %90, %93 : vector<8x32xf32>
    %95 = math.erf %94 : vector<8x32xf32>
    %cst_39 = arith.constant 1.000000e+00 : f32
    %96 = vector.broadcast %cst_39 : f32 to vector<8x32xf32>
    %97 = arith.addf %96, %95 : vector<8x32xf32>
    %98 = arith.mulf %92, %97 : vector<8x32xf32>
    %c0_40 = arith.constant 0 : index
    %c0_41 = arith.constant 0 : index
    %99 = vector.load %arg6[%c0_40, %c0_41] : memref<32x96xbf16, #tpu.memory_space<vmem>>, vector<32x96xbf16>
    %100 = arith.truncf %98 : vector<8x32xf32> to vector<8x32xbf16>
    %cst_42 = arith.constant dense<0.000000e+00> : vector<8x96xf32>
    %101 = tpu.matmul %100, %99, %cst_42 {dimension_numbers = #tpu.dot_dimension_numbers<[1], [0], [0], [1], [0, 0, 1, 1], [], []>} : vector<8x32xbf16>, vector<32x96xbf16>, vector<8x96xf32> -> vector<8x96xf32>
    %102 = vector.extract_strided_slice %101 {offsets = [0, 0], sizes = [8, 32], strides = [1, 1]} : vector<8x96xf32> to vector<8x32xf32>
    %cst_43 = arith.constant 0.000000e+00 : f32
    %103 = vector.broadcast %cst_43 : f32 to vector<8x32xf32>
    %104 = arith.cmpf ogt, %102, %103 : vector<8x32xf32>
    %cst_44 = arith.constant 0.000000e+00 : f32
    %105 = vector.broadcast %cst_44 : f32 to vector<8x32xf32>
    %106 = arith.minimumf %102, %105 : vector<8x32xf32>
    %107 = math.exp %106 : vector<8x32xf32>
    %cst_45 = arith.constant 1.000000e+00 : f32
    %108 = vector.broadcast %cst_45 : f32 to vector<8x32xf32>
    %109 = arith.subf %107, %108 : vector<8x32xf32>
    %110 = arith.select %104, %102, %109 : vector<8x32xi1>, vector<8x32xf32>
    %cst_46 = arith.constant 1.000000e+00 : f32
    %111 = vector.broadcast %cst_46 : f32 to vector<8x32xf32>
    %112 = arith.addf %110, %111 : vector<8x32xf32>
    %113 = vector.extract_strided_slice %101 {offsets = [0, 32], sizes = [8, 32], strides = [1, 1]} : vector<8x96xf32> to vector<8x32xf32>
    %cst_47 = arith.constant 0.000000e+00 : f32
    %114 = vector.broadcast %cst_47 : f32 to vector<8x32xf32>
    %115 = arith.cmpf ogt, %113, %114 : vector<8x32xf32>
    %cst_48 = arith.constant 0.000000e+00 : f32
    %116 = vector.broadcast %cst_48 : f32 to vector<8x32xf32>
    %117 = arith.minimumf %113, %116 : vector<8x32xf32>
    %118 = math.exp %117 : vector<8x32xf32>
    %cst_49 = arith.constant 1.000000e+00 : f32
    %119 = vector.broadcast %cst_49 : f32 to vector<8x32xf32>
    %120 = arith.subf %118, %119 : vector<8x32xf32>
    %121 = arith.select %115, %113, %120 : vector<8x32xi1>, vector<8x32xf32>
    %cst_50 = arith.constant 1.000000e+00 : f32
    %122 = vector.broadcast %cst_50 : f32 to vector<8x32xf32>
    %123 = arith.addf %121, %122 : vector<8x32xf32>
    %124 = vector.extract_strided_slice %101 {offsets = [0, 64], sizes = [8, 32], strides = [1, 1]} : vector<8x96xf32> to vector<8x32xf32>
    %125 = arith.truncf %124 : vector<8x32xf32> to vector<8x32xbf16>
    %126 = arith.truncf %123 : vector<8x32xf32> to vector<8x32xbf16>
    %cst_51 = arith.constant dense<0.000000e+00> : vector<8x8xf32>
    %127 = tpu.matmul %125, %126, %cst_51 {dimension_numbers = #tpu.dot_dimension_numbers<[1], [1], [0], [0], [0, 0, 1, 0], [], []>} : vector<8x32xbf16>, vector<8x32xbf16>, vector<8x8xf32> -> vector<8x8xf32>
    %cst_52 = arith.constant 0.176776692 : f32
    %128 = vector.broadcast %cst_52 : f32 to vector<8x8xf32>
    %129 = arith.mulf %127, %128 : vector<8x8xf32>
    %cst_53 = arith.constant dense<0xFF800000> : vector<8xf32>
    %130 = vector.multi_reduction <maximumf>, %129, %cst_53 [1] : vector<8x8xf32> to vector<8xf32>
    %131 = vector.shape_cast %130 : vector<8xf32> to vector<8x1xf32>
    %132 = vector.broadcast %131 : vector<8x1xf32> to vector<8x8xf32>
    %133 = arith.subf %129, %132 : vector<8x8xf32>
    %134 = math.exp %133 : vector<8x8xf32>
    %cst_54 = arith.constant dense<0.000000e+00> : vector<8xf32>
    %135 = vector.multi_reduction <add>, %134, %cst_54 [1] : vector<8x8xf32> to vector<8xf32>
    %136 = vector.shape_cast %135 : vector<8xf32> to vector<8x1xf32>
    %137 = tpu.reciprocal %136 {approx = true} : vector<8x1xf32> -> vector<8x1xf32>
    %138 = vector.broadcast %137 : vector<8x1xf32> to vector<8x8xf32>
    %139 = arith.mulf %134, %138 : vector<8x8xf32>
    %140 = arith.truncf %139 : vector<8x8xf32> to vector<8x8xbf16>
    %141 = arith.truncf %112 : vector<8x32xf32> to vector<8x32xbf16>
    %cst_55 = arith.constant dense<0.000000e+00> : vector<8x32xf32>
    %142 = tpu.matmul %140, %141, %cst_55 {dimension_numbers = #tpu.dot_dimension_numbers<[1], [0], [0], [1], [0, 0, 1, 1], [], []>} : vector<8x8xbf16>, vector<8x32xbf16>, vector<8x32xf32> -> vector<8x32xf32>
    %143 = arith.mulf %142, %37 : vector<8x32xf32>
    %c0_56 = arith.constant 0 : index
    %c0_57 = arith.constant 0 : index
    %144 = vector.load %arg7[%c0_56, %c0_57] : memref<32x32xbf16, #tpu.memory_space<vmem>>, vector<32x32xbf16>
    %145 = arith.truncf %143 : vector<8x32xf32> to vector<8x32xbf16>
    %cst_58 = arith.constant dense<0.000000e+00> : vector<8x32xf32>
    %146 = tpu.matmul %145, %144, %cst_58 {dimension_numbers = #tpu.dot_dimension_numbers<[1], [0], [0], [1], [0, 0, 1, 1], [], []>} : vector<8x32xbf16>, vector<32x32xbf16>, vector<8x32xf32> -> vector<8x32xf32>
    %c0_59 = arith.constant 0 : index
    %c0_60 = arith.constant 0 : index
    %147 = vector.load %arg8[%c0_59, %c0_60] : memref<1x32xf32, #tpu.memory_space<vmem>>, vector<1x32xf32>
    %148 = vector.broadcast %147 : vector<1x32xf32> to vector<8x32xf32>
    %149 = arith.addf %146, %148 : vector<8x32xf32>
    %150 = arith.addf %149, %98 : vector<8x32xf32>
    %151 = arith.addf %150, %22 : vector<8x32xf32>
    %c0_61 = arith.constant 0 : index
    %c0_62 = arith.constant 0 : index
    %152 = vector.load %arg9[%c0_61, %c0_62] : memref<1x32xf32, #tpu.memory_space<vmem>>, vector<1x32xf32>
    %c0_63 = arith.constant 0 : index
    %c0_64 = arith.constant 0 : index
    %153 = vector.load %arg10[%c0_63, %c0_64] : memref<1x32xf32, #tpu.memory_space<vmem>>, vector<1x32xf32>
    %cst_65 = arith.constant dense<0.000000e+00> : vector<8xf32>
    %154 = vector.multi_reduction <add>, %151, %cst_65 [1] : vector<8x32xf32> to vector<8xf32>
    %155 = vector.shape_cast %154 : vector<8xf32> to vector<8x1xf32>
    %cst_66 = arith.constant 3.200000e+01 : f32
    %156 = vector.broadcast %cst_66 : f32 to vector<8x1xf32>
    %157 = arith.divf %155, %156 : vector<8x1xf32>
    %158 = vector.broadcast %157 : vector<8x1xf32> to vector<8x32xf32>
    %159 = arith.subf %151, %158 : vector<8x32xf32>
    %160 = arith.mulf %159, %159 : vector<8x32xf32>
    %cst_67 = arith.constant dense<0.000000e+00> : vector<8xf32>
    %161 = vector.multi_reduction <add>, %160, %cst_67 [1] : vector<8x32xf32> to vector<8xf32>
    %162 = vector.shape_cast %161 : vector<8xf32> to vector<8x1xf32>
    %cst_68 = arith.constant 3.200000e+01 : f32
    %163 = vector.broadcast %cst_68 : f32 to vector<8x1xf32>
    %164 = arith.divf %162, %163 : vector<8x1xf32>
    %cst_69 = arith.constant 9.99999974E-6 : f32
    %165 = vector.broadcast %cst_69 : f32 to vector<8x1xf32>
    %166 = arith.addf %164, %165 : vector<8x1xf32>
    %167 = math.rsqrt %166 : vector<8x1xf32>
    %168 = vector.broadcast %167 : vector<8x1xf32> to vector<8x32xf32>
    %169 = arith.mulf %159, %168 : vector<8x32xf32>
    %170 = vector.broadcast %152 : vector<1x32xf32> to vector<8x32xf32>
    %171 = arith.mulf %169, %170 : vector<8x32xf32>
    %172 = vector.broadcast %153 : vector<1x32xf32> to vector<8x32xf32>
    %173 = arith.addf %171, %172 : vector<8x32xf32>
    %c0_70 = arith.constant 0 : index
    %c0_71 = arith.constant 0 : index
    %174 = vector.load %arg11[%c0_70, %c0_71] : memref<32x64xbf16, #tpu.memory_space<vmem>>, vector<32x64xbf16>
    %175 = arith.truncf %173 : vector<8x32xf32> to vector<8x32xbf16>
    %cst_72 = arith.constant dense<0.000000e+00> : vector<8x64xf32>
    %176 = tpu.matmul %175, %174, %cst_72 {dimension_numbers = #tpu.dot_dimension_numbers<[1], [0], [0], [1], [0, 0, 1, 1], [], []>} : vector<8x32xbf16>, vector<32x64xbf16>, vector<8x64xf32> -> vector<8x64xf32>
    %c0_73 = arith.constant 0 : index
    %c0_74 = arith.constant 0 : index
    %177 = vector.load %arg12[%c0_73, %c0_74] : memref<1x64xf32, #tpu.memory_space<vmem>>, vector<1x64xf32>
    %178 = vector.broadcast %177 : vector<1x64xf32> to vector<8x64xf32>
    %179 = arith.addf %176, %178 : vector<8x64xf32>
    %cst_75 = arith.constant 5.000000e-01 : f32
    %180 = vector.broadcast %cst_75 : f32 to vector<8x64xf32>
    %181 = arith.mulf %180, %179 : vector<8x64xf32>
    %cst_76 = arith.constant 0.707106769 : f32
    %182 = vector.broadcast %cst_76 : f32 to vector<8x64xf32>
    %183 = arith.mulf %179, %182 : vector<8x64xf32>
    %184 = math.erf %183 : vector<8x64xf32>
    %cst_77 = arith.constant 1.000000e+00 : f32
    %185 = vector.broadcast %cst_77 : f32 to vector<8x64xf32>
    %186 = arith.addf %185, %184 : vector<8x64xf32>
    %187 = arith.mulf %181, %186 : vector<8x64xf32>
    %c0_78 = arith.constant 0 : index
    %c0_79 = arith.constant 0 : index
    %188 = vector.load %arg13[%c0_78, %c0_79] : memref<64x32xbf16, #tpu.memory_space<vmem>>, vector<64x32xbf16>
    %189 = arith.truncf %187 : vector<8x64xf32> to vector<8x64xbf16>
    %cst_80 = arith.constant dense<0.000000e+00> : vector<8x32xf32>
    %190 = tpu.matmul %189, %188, %cst_80 {dimension_numbers = #tpu.dot_dimension_numbers<[1], [0], [0], [1], [0, 0, 1, 1], [], []>} : vector<8x64xbf16>, vector<64x32xbf16>, vector<8x32xf32> -> vector<8x32xf32>
    %c0_81 = arith.constant 0 : index
    %c0_82 = arith.constant 0 : index
    %191 = vector.load %arg14[%c0_81, %c0_82] : memref<1x32xf32, #tpu.memory_space<vmem>>, vector<1x32xf32>
    %192 = vector.broadcast %191 : vector<1x32xf32> to vector<8x32xf32>
    %193 = arith.addf %190, %192 : vector<8x32xf32>
    %194 = arith.addf %193, %151 : vector<8x32xf32>
    %195 = arith.addf %0, %194 : vector<8x32xf32>
    %c0_83 = arith.constant 0 : index
    %c0_84 = arith.constant 0 : index
    %196 = vector.load %arg15[%c0_83, %c0_84] : memref<1x32xf32, #tpu.memory_space<vmem>>, vector<1x32xf32>
    %c0_85 = arith.constant 0 : index
    %c0_86 = arith.constant 0 : index
    %197 = vector.load %arg16[%c0_85, %c0_86] : memref<1x32xf32, #tpu.memory_space<vmem>>, vector<1x32xf32>
    %cst_87 = arith.constant dense<0.000000e+00> : vector<8xf32>
    %198 = vector.multi_reduction <add>, %195, %cst_87 [1] : vector<8x32xf32> to vector<8xf32>
    %199 = vector.shape_cast %198 : vector<8xf32> to vector<8x1xf32>
    %cst_88 = arith.constant 3.200000e+01 : f32
    %200 = vector.broadcast %cst_88 : f32 to vector<8x1xf32>
    %201 = arith.divf %199, %200 : vector<8x1xf32>
    %202 = vector.broadcast %201 : vector<8x1xf32> to vector<8x32xf32>
    %203 = arith.subf %195, %202 : vector<8x32xf32>
    %204 = arith.mulf %203, %203 : vector<8x32xf32>
    %cst_89 = arith.constant dense<0.000000e+00> : vector<8xf32>
    %205 = vector.multi_reduction <add>, %204, %cst_89 [1] : vector<8x32xf32> to vector<8xf32>
    %206 = vector.shape_cast %205 : vector<8xf32> to vector<8x1xf32>
    %cst_90 = arith.constant 3.200000e+01 : f32
    %207 = vector.broadcast %cst_90 : f32 to vector<8x1xf32>
    %208 = arith.divf %206, %207 : vector<8x1xf32>
    %cst_91 = arith.constant 9.99999974E-6 : f32
    %209 = vector.broadcast %cst_91 : f32 to vector<8x1xf32>
    %210 = arith.addf %208, %209 : vector<8x1xf32>
    %211 = math.rsqrt %210 : vector<8x1xf32>
    %212 = vector.broadcast %211 : vector<8x1xf32> to vector<8x32xf32>
    %213 = arith.mulf %203, %212 : vector<8x32xf32>
    %214 = vector.broadcast %196 : vector<1x32xf32> to vector<8x32xf32>
    %215 = arith.mulf %213, %214 : vector<8x32xf32>
    %216 = vector.broadcast %197 : vector<1x32xf32> to vector<8x32xf32>
    %217 = arith.addf %215, %216 : vector<8x32xf32>
    %c0_92 = arith.constant 0 : index
    %c0_93 = arith.constant 0 : index
    %218 = vector.load %arg17[%c0_92, %c0_93] : memref<32x32xbf16, #tpu.memory_space<vmem>>, vector<32x32xbf16>
    %219 = arith.truncf %217 : vector<8x32xf32> to vector<8x32xbf16>
    %cst_94 = arith.constant dense<0.000000e+00> : vector<8x32xf32>
    %220 = tpu.matmul %219, %218, %cst_94 {dimension_numbers = #tpu.dot_dimension_numbers<[1], [0], [0], [1], [0, 0, 1, 1], [], []>} : vector<8x32xbf16>, vector<32x32xbf16>, vector<8x32xf32> -> vector<8x32xf32>
    %c0_95 = arith.constant 0 : index
    %c0_96 = arith.constant 0 : index
    %221 = vector.load %arg18[%c0_95, %c0_96] : memref<1x32xf32, #tpu.memory_space<vmem>>, vector<1x32xf32>
    %222 = vector.broadcast %221 : vector<1x32xf32> to vector<8x32xf32>
    %223 = arith.addf %220, %222 : vector<8x32xf32>
    %cst_97 = arith.constant 5.000000e-01 : f32
    %224 = vector.broadcast %cst_97 : f32 to vector<8x32xf32>
    %225 = arith.mulf %224, %223 : vector<8x32xf32>
    %cst_98 = arith.constant 0.707106769 : f32
    %226 = vector.broadcast %cst_98 : f32 to vector<8x32xf32>
    %227 = arith.mulf %223, %226 : vector<8x32xf32>
    %228 = math.erf %227 : vector<8x32xf32>
    %cst_99 = arith.constant 1.000000e+00 : f32
    %229 = vector.broadcast %cst_99 : f32 to vector<8x32xf32>
    %230 = arith.addf %229, %228 : vector<8x32xf32>
    %231 = arith.mulf %225, %230 : vector<8x32xf32>
    %c0_100 = arith.constant 0 : index
    %c0_101 = arith.constant 0 : index
    %232 = vector.load %arg19[%c0_100, %c0_101] : memref<32x32xbf16, #tpu.memory_space<vmem>>, vector<32x32xbf16>
    %233 = arith.truncf %231 : vector<8x32xf32> to vector<8x32xbf16>
    %cst_102 = arith.constant dense<0.000000e+00> : vector<8x32xf32>
    %234 = tpu.matmul %233, %232, %cst_102 {dimension_numbers = #tpu.dot_dimension_numbers<[1], [0], [0], [1], [0, 0, 1, 1], [], []>} : vector<8x32xbf16>, vector<32x32xbf16>, vector<8x32xf32> -> vector<8x32xf32>
    %c0_103 = arith.constant 0 : index
    %c0_104 = arith.constant 0 : index
    %235 = vector.load %arg20[%c0_103, %c0_104] : memref<1x32xf32, #tpu.memory_space<vmem>>, vector<1x32xf32>
    %236 = vector.broadcast %235 : vector<1x32xf32> to vector<8x32xf32>
    %237 = arith.addf %234, %236 : vector<8x32xf32>
    %238 = arith.addf %195, %237 : vector<8x32xf32>
    %c0_105 = arith.constant 0 : index
    %c0_106 = arith.constant 0 : index
    %239 = vector.load %arg21[%c0_105, %c0_106] : memref<32x1xbf16, #tpu.memory_space<vmem>>, vector<32x1xbf16>
    %240 = arith.truncf %238 : vector<8x32xf32> to vector<8x32xbf16>
    %cst_107 = arith.constant dense<0.000000e+00> : vector<8x1xf32>
    %241 = tpu.matmul %240, %239, %cst_107 {dimension_numbers = #tpu.dot_dimension_numbers<[1], [0], [0], [1], [0, 0, 1, 1], [], []>} : vector<8x32xbf16>, vector<32x1xbf16>, vector<8x1xf32> -> vector<8x1xf32>
    %c0_108 = arith.constant 0 : index
    %c0_109 = arith.constant 0 : index
    %242 = vector.load %arg22[%c0_108, %c0_109] : memref<1x1xf32, #tpu.memory_space<vmem>>, vector<1x1xf32>
    %243 = vector.broadcast %242 : vector<1x1xf32> to vector<8x1xf32>
    %244 = arith.addf %241, %243 : vector<8x1xf32>
    %c0_110 = arith.constant 0 : index
    %c0_111 = arith.constant 0 : index
    %245 = vector.load %arg25[%c0_110, %c0_111] : memref<8x1xf32, #tpu.memory_space<vmem>>, vector<8x1xf32>
    tpu.vector_store %arg25[%c0_110, %c0_111], %244 {strides = array<i32>} : memref<8x1xf32, #tpu.memory_space<vmem>>, vector<8x1xf32>,
    return
  }
  func.func @transform_0(%arg0: i32) -> (i32, i32) {
    %c0_i32 = arith.constant 0 : i32
    %c0_i32_0 = arith.constant 0 : i32
    %c0_i32_1 = arith.constant 0 : i32
    return %c0_i32, %c0_i32_0 : i32, i32
  }
  func.func @transform_1(%arg0: i32) -> (i32, i32) {
    %c0_i32 = arith.constant 0 : i32
    %c0_i32_0 = arith.constant 0 : i32
    %c0_i32_1 = arith.constant 0 : i32
    return %c0_i32, %c0_i32_0 : i32, i32
  }
  func.func @transform_2(%arg0: i32) -> (i32, i32) {
    %c0_i32 = arith.constant 0 : i32
    %c0_i32_0 = arith.constant 0 : i32
    %c0_i32_1 = arith.constant 0 : i32
    return %c0_i32, %c0_i32_0 : i32, i32
  }
  func.func @transform_3(%arg0: i32) -> (i32, i32) {
    %c0_i32 = arith.constant 0 : i32
    %c0_i32_0 = arith.constant 0 : i32
    %c0_i32_1 = arith.constant 0 : i32
    return %c0_i32, %c0_i32_0 : i32, i32
  }
  func.func @transform_4(%arg0: i32) -> (i32, i32) {
    %c0_i32 = arith.constant 0 : i32
    %c0_i32_0 = arith.constant 0 : i32
    %c0_i32_1 = arith.constant 0 : i32
    return %c0_i32, %c0_i32_0 : i32, i32
  }
  func.func @transform_5(%arg0: i32) -> (i32, i32) {
    %c0_i32 = arith.constant 0 : i32
    %c0_i32_0 = arith.constant 0 : i32
    %c0_i32_1 = arith.constant 0 : i32
    return %c0_i32, %c0_i32_0 : i32, i32
  }
  func.func @transform_6(%arg0: i32) -> (i32, i32) {
    %c0_i32 = arith.constant 0 : i32
    %c0_i32_0 = arith.constant 0 : i32
    %c0_i32_1 = arith.constant 0 : i32
    return %c0_i32, %c0_i32_0 : i32, i32
  }
  func.func @transform_7(%arg0: i32) -> (i32, i32) {
    %c0_i32 = arith.constant 0 : i32
    %c0_i32_0 = arith.constant 0 : i32
    %c0_i32_1 = arith.constant 0 : i32
    return %c0_i32, %c0_i32_0 : i32, i32
  }
  func.func @transform_8(%arg0: i32) -> (i32, i32) {
    %c0_i32 = arith.constant 0 : i32
    %c0_i32_0 = arith.constant 0 : i32
    %c0_i32_1 = arith.constant 0 : i32
    return %c0_i32, %c0_i32_0 : i32, i32
  }
  func.func @transform_9(%arg0: i32) -> (i32, i32) {
    %c0_i32 = arith.constant 0 : i32
    %c0_i32_0 = arith.constant 0 : i32
    %c0_i32_1 = arith.constant 0 : i32
    return %c0_i32, %c0_i32_0 : i32, i32
  }
  func.func @transform_10(%arg0: i32) -> (i32, i32) {
    %c0_i32 = arith.constant 0 : i32
    %c0_i32_0 = arith.constant 0 : i32
    %c0_i32_1 = arith.constant 0 : i32
    return %c0_i32, %c0_i32_0 : i32, i32
  }
  func.func @transform_11(%arg0: i32) -> (i32, i32) {
    %c0_i32 = arith.constant 0 : i32
    %c0_i32_0 = arith.constant 0 : i32
    %c0_i32_1 = arith.constant 0 : i32
    return %c0_i32, %c0_i32_0 : i32, i32
  }
  func.func @transform_12(%arg0: i32) -> (i32, i32) {
    %c0_i32 = arith.constant 0 : i32
    %c0_i32_0 = arith.constant 0 : i32
    %c0_i32_1 = arith.constant 0 : i32
    return %c0_i32, %c0_i32_0 : i32, i32
  }
  func.func @transform_13(%arg0: i32) -> (i32, i32) {
    %c0_i32 = arith.constant 0 : i32
    %c0_i32_0 = arith.constant 0 : i32
    %c0_i32_1 = arith.constant 0 : i32
    return %c0_i32, %c0_i32_0 : i32, i32
  }
  func.func @transform_14(%arg0: i32) -> (i32, i32) {
    %c0_i32 = arith.constant 0 : i32
    %c0_i32_0 = arith.constant 0 : i32
    %c0_i32_1 = arith.constant 0 : i32
    return %c0_i32, %c0_i32_0 : i32, i32
  }
  func.func @transform_15(%arg0: i32) -> (i32, i32) {
    %c0_i32 = arith.constant 0 : i32
    %c0_i32_0 = arith.constant 0 : i32
    %c0_i32_1 = arith.constant 0 : i32
    return %c0_i32, %c0_i32_0 : i32, i32
  }
  func.func @transform_16(%arg0: i32) -> (i32, i32) {
    %c0_i32 = arith.constant 0 : i32
    %c0_i32_0 = arith.constant 0 : i32
    %c0_i32_1 = arith.constant 0 : i32
    return %c0_i32, %c0_i32_0 : i32, i32
  }
  func.func @transform_17(%arg0: i32) -> (i32, i32) {
    %c0_i32 = arith.constant 0 : i32
    %c0_i32_0 = arith.constant 0 : i32
    %c0_i32_1 = arith.constant 0 : i32
    return %c0_i32, %c0_i32_0 : i32, i32
  }
  func.func @transform_18(%arg0: i32) -> (i32, i32) {
    %c0_i32 = arith.constant 0 : i32
    %c0_i32_0 = arith.constant 0 : i32
    %c0_i32_1 = arith.constant 0 : i32
    return %c0_i32, %c0_i32_0 : i32, i32
  }
  func.func @transform_19(%arg0: i32) -> (i32, i32) {
    %c0_i32 = arith.constant 0 : i32
    %c0_i32_0 = arith.constant 0 : i32
    %c0_i32_1 = arith.constant 0 : i32
    return %c0_i32, %c0_i32_0 : i32, i32
  }
  func.func @transform_20(%arg0: i32) -> (i32, i32) {
    %c0_i32 = arith.constant 0 : i32
    %c0_i32_0 = arith.constant 0 : i32
    %c0_i32_1 = arith.constant 0 : i32
    return %c0_i32, %c0_i32_0 : i32, i32
  }
  func.func @transform_21(%arg0: i32) -> (i32, i32) {
    %c0_i32 = arith.constant 0 : i32
    %c0_i32_0 = arith.constant 0 : i32
    %c0_i32_1 = arith.constant 0 : i32
    return %c0_i32, %c0_i32_0 : i32, i32
  }
  func.func @transform_22(%arg0: i32) -> (i32, i32) {
    %c0_i32 = arith.constant 0 : i32
    %c0_i32_0 = arith.constant 0 : i32
    %c0_i32_1 = arith.constant 0 : i32
    return %c0_i32, %c0_i32_0 : i32, i32
  }
  func.func @transform_23(%arg0: i32) -> i32 {
    %c0_i32 = arith.constant 0 : i32
    %c0_i32_0 = arith.constant 0 : i32
    return %c0_i32 : i32
  }
  func.func @transform_24(%arg0: i32) -> (i32, i32) {
    %c0_i32 = arith.constant 0 : i32
    %c0_i32_0 = arith.constant 0 : i32
    %c0_i32_1 = arith.constant 0 : i32
    return %c0_i32, %c0_i32_0 : i32, i32
  }
}

</mosaic_0001>

<bundles_post_ra>
// kernel: specformer_forward.5
= control target key start
LH: loop header
LB: loop body
LE: loop exit
PB: predicated region body
PF: predicated region fallthrough
CT: control target
= control target key end

     0   :  { %v180_v1 = vmov 0.0   ;;  %vm43_vm0 = vcmask 1043456   ;;  %vm181_vm1 = vmmov 0   ;;  %v182_v6 = vmov 0   ;;  %s227_s0 = inlined_call_operand.vmem [shape: bf16[8,8], index: 0, kind: input, shape index: {}]   ;;  %s228_s1 = inlined_call_operand.vmem [shape: f32[8,4], index: 1, kind: input, shape index: {}]   ;;  %s229_s2 = inlined_call_operand.vmem [shape: f32[8,1], index: 2, kind: input, shape index: {}]   ;;  %s230_s3 = inlined_call_operand.vmem [shape: f32[1,2,4], index: 3, kind: input, shape index: {}]   ;;  %s231_s4 = inlined_call_operand.vmem [shape: f32[8,4], index: 4, kind: output, shape index: {}]  }
   0x1   :  { %v18_v0 = vld [vmem:[%s227_s0] sm:$0xf]  ;;  %164 = vmatprep.subr.bf16.mxu0 %v180_v1  ;;  %166 = vmatprep.mubr.msk.bf16.mxu0 %vm181_vm1, %v180_v1  ;;  %vm39_vm2 = vcmask 64512   ;;  %v93_v8 = vlaneseq  ;;  %vm152_vm3 = vcmask 31744  }
   0x2   :  { %v20_v2 = vld [vmem:[%s228_s1] sm:$0xff]  ;;  %23 = vxpose.xlu0.c.b16.start.end [1/1] (short) (narrow) %v18_v0, 16  ;;  %170 = vmatprep.subr.bf16.mxu1 %v180_v1 }
   0x3   :  { %v22_v3 = vpack.c.bf16 %v20_v2, %v20_v2  ;;  %172 = vmatprep.mubr.msk.bf16.mxu1 %vm181_vm1, %v180_v1  ;;  %v19_v5 = vld [vmem:[%s229_s2] sm:$0xff]  ;;  %v94_v9 = vshrl.u32 %v93_v8, 7 }
   0x4   :  { %v21_v11 = vld [vmem:[%s230_s3] sm:$0x3] }
   0x5   :  { %v45_v4 = vsel %vm43_vm0, %v22_v3, 0  ;;  %v101_v10 = vsub.s32 0, %v94_v9  ;;  %v95_v13 = vsub.s32 1, %v94_v9 }
   0x6   :  { %165 = vmatpush3.bf16.msra.mxu0 %v45_v4 }
   0x7   :  { %v102_v12 = vrot.slane %v21_v11, %v101_v10  ;;  %v96_v15 = vrot.slane %v21_v11, %v95_v13 }
   0x9   :  { %v103_v24 = vmul.f32 %v102_v12, %v20_v2 }
   0xb   :  { %179 = vset.pattern.permute.xlu0 %v182_v6 }
   0xc   :  { %89 = vperm.xlu0 %179, %v19_v5  }
  0x64   :  { %v31_v7 = vpop.trf.xlu0 }
  0x65   :  { %167 = vmatmul.mubr.msk.bf16.vlgmr.msra.gmra.mxu0 %vm39_vm2, %v31_v7 }
  0x87   :  { %v90_v14 = vpop.permute.xlu0 %89 }
 0x125   :  { %v81_v16 = vpop.f32.mrf.mxu0 }
 0x126   :  { %v92_v17 = vmul.f32 %v90_v14, %v81_v16 }
 0x127   :  { %v168_v18 = vpop.f32.mrf.mxu0 }
 0x128   :  { %v97_v19 = vmul.f32 %v96_v15, %v92_v17 }
 0x129   :  { %v84_v20 = vpop.f32.mrf.mxu0 }
 0x12a   :  { %v104_v21 = vpack.c.bf16 %v97_v19, %v97_v19 }
 0x12b   :  { %v169_v22 = vpop.f32.mrf.mxu0 }
 0x12c   :  { %v109_v23 = vsel %vm43_vm0, %v104_v21, 0 }
 0x12d   :  { %171 = vmatpush3.bf16.msra.mxu1 %v109_v23 }
 0x130   :  { %173 = vmatmul.mubr.msk.bf16.vlgmr.msra.gmra.mxu1 %vm39_vm2, %v18_v0 }
 0x1f0   :  { %v145_v25 = vpop.f32.mrf.mxu1 }
 0x1f1   :  { %v151_v26 = vadd.f32 %v145_v25, %v103_v24 }
 0x1f2   :  { %v174_v27 = vpop.f32.mrf.mxu1 }
 0x1f3   :  { %153 = vst.msk [vmem:[%s231_s4] sm:$0xff] %vm152_vm3, %v151_v26 }
 0x1f4   :  { %v148_v28 = vpop.f32.mrf.mxu1 }
 0x1f6   :  { %v175_v29 = vpop.f32.mrf.mxu1 }

// kernel: specformer_forward.3
= control target key start
LH: loop header
LB: loop body
LE: loop exit
PB: predicated region body
PF: predicated region fallthrough
CT: control target
= control target key end

     0   :  { %vm58_vm0 = vcmask 130048   ;;  %vm206_vm1 = vcmask 1040384   ;;  %v384_v0 = vmov 0.0   ;;  %vm385_vm2 = vmmov 0   ;;  %s509_s3 = inlined_call_operand.vmem [shape: bf16[16,32], index: 3, kind: input, shape index: {}]   ;;  %s510_s0 = inlined_call_operand.vmem [shape: f32[8,16], index: 0, kind: input, shape index: {}]   ;;  %s511_s7 = inlined_call_operand.vmem [shape: bf16[33,32], index: 7, kind: input, shape index: {}]   ;;  %s512_s5 = inlined_call_operand.vmem [shape: bf16[32,4], index: 5, kind: input, shape index: {}]   ;;  %s513_s1 = inlined_call_operand.vmem [shape: f32[8,33], index: 1, kind: input, shape index: {}]   ;;  %s514_s4 = inlined_call_operand.vmem [shape: f32[1,32], index: 4, kind: input, shape index: {}]   ;;  %s515_s9 = inlined_call_operand.vmem [shape: bf16[2,32], index: 9, kind: input, shape index: {}]   ;;  %s516_s2 = inlined_call_operand.vmem [shape: f32[8,2], index: 2, kind: input, shape index: {}]   ;;  %s517_s6 = inlined_call_operand.vmem [shape: f32[1,4], index: 6, kind: input, shape index: {}]   ;;  %s518_s8 = inlined_call_operand.vmem [shape: f32[1,32], index: 8, kind: input, shape index: {}]   ;;  %s519_s11 = inlined_call_operand.vmem [shape: f32[8,4], index: 11, kind: output, shape index: {0}]   ;;  %s520_s10 = inlined_call_operand.vmem [shape: f32[1,32], index: 10, kind: input, shape index: {}]   ;;  %s521_s12 = inlined_call_operand.vmem [shape: f32[8,32], index: 12, kind: output, shape index: {1}]  }
   0x1   :  { %345 = vmatprep.subr.bf16.mxu0 %v384_v0  ;;  %v378_v1 = vld [vmem:[%s509_s3] sm:$0xff]   ;;  %347 = vmatprep.mubr.msk.bf16.mxu0 %vm385_vm2, %v384_v0  ;;  %v379_v3 = vld [vmem:[%s511_s7 + $0x10] ss:$0 sps:$4 sm:$0x11]   ;;  %v386_v5 = vmov 0   ;;  %v380_v7 = vld [vmem:[%s512_s5 + $0x8] sm:$0xff]  }
   0x2   :  { %v41_v2 = vld [vmem:[%s510_s0] sm:$0xff]  ;;  %351 = vmatprep.subr.bf16.mxu1 %v384_v0  ;;  %355 = vmatprep.mubr.msk.bf16.mxu1 %vm385_vm2, %v384_v0  ;;  %v208_v6 = vsel %vm206_vm1, 65535, %v386_v5  ;;  %v381_v9 = vld [vmem:[%s511_s7 + $0x8] sm:$0xff]   ;;  %vm202_vm3 = vcmask 269312   ;;  %vm127_vm4 = vcmask 261120   ;;  %vm255_vm5 = vcmask 15360  }
   0x3   :  { %346 = vmatpush3.bf16.msra.mxu0 %v378_v1  ;;  %v44_v4 = vpack.c.bf16 %v41_v2, %v41_v2  ;;  %v210_v8 = vand.u32 %v379_v3, %v208_v6  ;;  %352 = vmatpush3.bf16.msra.mxu1 %v380_v7  ;;  %v382_v10 = vld [vmem:[%s512_s5] sm:$0xff]   ;;  %vm171_vm6 = vcmask 31744  }
   0x4   :  { %359 = vmatprep.subr.bf16.mxu0 %v384_v0  ;;  %353 = vmatprep.subr.bf16.mxu1 %v384_v0  ;;  %v383_v11 = vld [vmem:[%s511_s7] sm:$0xff]  }
   0x5   :  { %v173_v12 = vld [vmem:[%s513_s1] sm:$0xff] }
   0x6   :  { %348 = vmatmul.mubr.msk.bf16.vlgmr.msra.gmra.mxu0 %vm58_vm0, %v44_v4  ;;  %v179_v13 = vpack.c.bf16 %v173_v12, %v173_v12  ;;  %v320_v14 = vld [vmem:[%s514_s4] ss:$0 sm:$0xff] }
   0x7   :  { %360 = vmatpush3.bf16.msra.mxu0 %v210_v8  ;;  %365 = vmatprep.mubr.msk.bf16.mxu0 %vm385_vm2, %v384_v0  ;;  %v253_v18 = vld [vmem:[%s515_s9] sm:$0x1] }
   0x8   :  { %361 = vmatprep.subr.bf16.mxu0 %v384_v0  ;;  %354 = vmatpush3.bf16.msra.mxu1 %v382_v10  ;;  %v260_v22 = vsel %vm206_vm1, %v253_v18, 0  ;;  %v252_v24 = vld [vmem:[%s516_s2] sm:$0xff] }
   0x9   :  { %369 = vmatprep.subr.bf16.mxu1 %v384_v0  ;;  %v254_v25 = vpack.c.bf16 %v252_v24, %v252_v24  ;;  %v323_v30 = vld [vmem:[%s517_s6] ss:$0 sm:$0xff] }
   0xa   :  { %v327_v33 = vld [vmem:[%s518_s8] ss:$0 sm:$0xff] }
   0xb   :  { %362 = vmatpush3.bf16.msra.mxu0 %v381_v9  ;;  %v333_v39 = vld [vmem:[%s520_s10] ss:$0 sm:$0xff] }
   0xc   :  { %363 = vmatprep.subr.bf16.mxu0 %v384_v0 }
   0xf   :  { %364 = vmatpush3.bf16.msra.mxu0 %v383_v11 }
  0x12   :  { %366 = vmatmul.mubr.msk.bf16.vlgmr.msra.gmra.mxu0 %vm202_vm3, %v179_v13 }
  0xc6   :  { %v96_v15 = vpop.f32.mrf.mxu0 }
  0xc7   :  { %v97_v16 = vadd.f32 %v320_v14, %v96_v15 }
  0xc8   :  { %v349_v17 = vpop.f32.mrf.mxu0 }
  0xc9   :  { %v102_v19 = vmax.f32 %v97_v16, 0.0 }
  0xca   :  { %v99_v20 = vpop.f32.mrf.mxu0 }
  0xcb   :  { %v107_v21 = vpack.c.bf16 %v102_v19, %v102_v19 }
  0xcc   :  { %v350_v23 = vpop.f32.mrf.mxu0 }
  0xcd   :  { %356 = vmatmul.mubr.msk.bf16.vlgmr.msra.gmra.mxu1 %vm127_vm4, %v107_v21 }
  0xce   :  { %370 = vmatpush3.bf16.msra.mxu1 %v260_v22  ;;  %371 = vmatprep.mubr.msk.bf16.mxu1 %vm385_vm2, %v384_v0 }
  0xd2   :  { %v246_v26 = vpop.f32.mrf.mxu0 }
  0xd3   :  { %v247_v36 = vadd.f32 %v327_v33, %v246_v26 }
  0xd4   :  { %v367_v27 = vpop.f32.mrf.mxu0 }
  0xd5   :  { %372 = vmatmul.mubr.msk.bf16.vlgmr.msra.gmra.mxu1 %vm255_vm5, %v254_v25 }
  0xd6   :  { %v249_v28 = vpop.f32.mrf.mxu0 }
  0xd8   :  { %v368_v29 = vpop.f32.mrf.mxu0 }
 0x18d   :  { %v165_v31 = vpop.f32.mrf.mxu1 }
 0x18e   :  { %v166_v32 = vadd.f32 %v323_v30, %v165_v31 }
 0x18f   :  { %v357_v34 = vpop.f32.mrf.mxu1 }
 0x190   :  { %172 = vst.msk [vmem:[%s519_s11] sm:$0xff] %vm171_vm6, %v166_v32 }
 0x191   :  { %v168_v35 = vpop.f32.mrf.mxu1 }
 0x193   :  { %v358_v37 = vpop.f32.mrf.mxu1 }
 0x195   :  { %v296_v38 = vpop.f32.mrf.mxu1 }
 0x196   :  { %v302_v40 = vadd.f32 %v296_v38, %v247_v36 }
 0x197   :  { %v373_v41 = vpop.f32.mrf.mxu1 }
 0x198   :  { %v310_v42 = vadd.f32 %v333_v39, %v302_v40 }
 0x199   :  { %v299_v43 = vpop.f32.mrf.mxu1 }
 0x19a   :  { %311 = vst.msk [vmem:[%s521_s12] sm:$0xff] %vm127_vm4, %v310_v42 }
 0x19b   :  { %v374_v44 = vpop.f32.mrf.mxu1 }

// kernel: specformer_forward.4
= control target key start
LH: loop header
LB: loop body
LE: loop exit
PB: predicated region body
PF: predicated region fallthrough
CT: control target
= control target key end

     0   :  { %s1565_s0 = inlined_call_operand.vmem [shape: f32[8,32], index: 0, kind: input, shape index: {}]   ;;  %s1566_s1 = inlined_call_operand.vmem [shape: f32[1,32], index: 1, kind: input, shape index: {}]   ;;  %s1567_s2 = inlined_call_operand.vmem [shape: f32[1,32], index: 2, kind: input, shape index: {}]   ;;  %s1568_s3 = inlined_call_operand.vmem [shape: bf16[32,64], index: 3, kind: input, shape index: {}]   ;;  %s1569_s4 = inlined_call_operand.vmem [shape: f32[1,64], index: 4, kind: input, shape index: {}]   ;;  %s1570_s5 = inlined_call_operand.vmem [shape: bf16[32,96], index: 5, kind: input, shape index: {}]   ;;  %s1571_s6 = inlined_call_operand.vmem [shape: bf16[32,32], index: 6, kind: input, shape index: {}]   ;;  %s1572_s7 = inlined_call_operand.vmem [shape: f32[1,32], index: 7, kind: input, shape index: {}]   ;;  %s1573_s8 = inlined_call_operand.vmem [shape: f32[1,32], index: 8, kind: input, shape index: {}]   ;;  %s1574_s9 = inlined_call_operand.vmem [shape: f32[1,32], index: 9, kind: input, shape index: {}]   ;;  %s1575_s10 = inlined_call_operand.vmem [shape: bf16[32,64], index: 10, kind: input, shape index: {}]   ;;  %s1576_s11 = inlined_call_operand.vmem [shape: f32[1,64], index: 11, kind: input, shape index: {}]   ;;  %s1577_s12 = inlined_call_operand.vmem [shape: bf16[64,32], index: 12, kind: input, shape index: {}]   ;;  %s1578_s13 = inlined_call_operand.vmem [shape: f32[1,32], index: 13, kind: input, shape index: {}]   ;;  %s1579_s14 = inlined_call_operand.vmem [shape: f32[1,32], index: 14, kind: input, shape index: {}]   ;;  %s1580_s15 = inlined_call_operand.vmem [shape: f32[1,32], index: 15, kind: input, shape index: {}]   ;;  %s1581_s16 = inlined_call_operand.vmem [shape: bf16[32,32], index: 16, kind: input, shape index: {}]   ;;  %s1582_s17 = inlined_call_operand.vmem [shape: f32[1,32], index: 17, kind: input, shape index: {}]   ;;  %s1583_s18 = inlined_call_operand.vmem [shape: bf16[32,32], index: 18, kind: input, shape index: {}]   ;;  %s1584_s19 = inlined_call_operand.vmem [shape: f32[1,32], index: 19, kind: input, shape index: {}]   ;;  %s1585_s20 = inlined_call_operand.vmem [shape: bf16[32,1], index: 20, kind: input, shape index: {}]   ;;  %s1586_s21 = inlined_call_operand.<no memory space> [shape: f32[1,1], index: 21, kind: input, shape index: {}]   ;;  %s1587_s22 = inlined_call_operand.vmem [shape: f32[3,3], index: 22, kind: input, shape index: {}]   ;;  %s1588_s23 = inlined_call_operand.<no memory space> [shape: f32[1], index: 23, kind: input, shape index: {}]   ;;  %s1589_s24 = inlined_call_operand.vmem [shape: f32[8,1], index: 24, kind: output, shape index: {}]  }
   0x1   :  { %1593 = sst [smem:[#allocation7_spill]] %s1565_s0  ;;  %v29_v0 = vstv %s1586_s21 }
   0x2   :  { %1594 = sst [smem:[#allocation8_spill]] %s1566_s1  ;;  %30 = vst [vmem:[#allocation2] sm:$0x1] %v29_v0 }
   0x3   :  { %1595 = sst [smem:[#allocation9_spill]] %s1567_s2 }
   0x4   :  { %1596 = sst [smem:[#allocation10_spill]] %s1568_s3 }
   0x5   :  { %1597 = sst [smem:[#allocation11_spill]] %s1569_s4 }
   0x6   :  { %1598 = sst [smem:[#allocation12_spill]] %s1570_s5 }
   0x7   :  { %1599 = sst [smem:[#allocation13_spill]] %s1571_s6 }
   0x8   :  { %1600 = sst [smem:[#allocation14_spill]] %s1572_s7 }
   0x9   :  { %1601 = sst [smem:[#allocation15_spill]] %s1573_s8 }
   0xa   :  { %32 = vsyncpa [#allocation5], 0  ;;  %s83_s6 = sshll.u32 %s1587_s22, 4  ;;  %s84_s6 = int_to_ptr.vmem [resolvable:$true] %s83_s6 }
   0xb   :  { %s1210_s2 = scalar_lea.vmem %s84_s6, 64  ;;  %p1215_p1 = scmp.lt.s32.totalorder %s84_s6, %s84_s6 }
   0xc   :  { %p1211_p0 = scmp.ne.s32.totalorder %s84_s6, %s1210_s2  ;;  %p1216_p2 = scmp.lt.s32.totalorder %s1210_s2, %s1210_s2 }
   0xe   :  { %p1217_p3 = por %p1216_p2, %p1215_p1 }
  0x10   :  { %p1218_p4 = pnand %p1217_p3, %p1211_p0 }
  0x12   :  { %1221 = shalt.err (!%p1218_p4)
}
  0x13   :  { %s1224_s29 = smov [#allocation4]  }
  0x14   :  { %86 = dma.vmem_to_smem %s84_s6, 64, %s1224_s29, [#allocation5]  }
  0x15   :  { %1222 = dma.done.wait [#allocation5], 64  }
  0x16   :  { %1223 = vsyncadd [#allocation5], 4294967232 }
  0x17   :  { %92 = sfence }
  0x18   :  { %s1602_s7 = sld [smem:[#allocation7_spill]]  ;;  %vm97_vm0 = vcmask 261120   ;;  %v1225_v9 = vmov 0.0   ;;  %vm1226_vm1 = vmmov 0   ;;  %s1227_s21 = smov 1   ;;  %vm203_vm2 = vcmask 7168  }
  0x19   :  { %s1603_s3 = sld [smem:[#allocation10_spill]]  ;;  %1082 = vmatprep.subr.bf16.mxu0 %v1225_v9  ;;  %1086 = vmatprep.mubr.msk.bf16.mxu0 %vm1226_vm1, %v1225_v9  ;;  %vm205_vm3 = vcmask 269312   ;;  %vm210_vm4 = vcmask 1040384   ;;  %vm239_vm5 = vcmask 1046528   ;;  %s1228_s1 = smov 126   ;;  %vm277_vm6 = vcmask 1045504  }
  0x1a   :  { %1090 = vmatprep.subr.bf16.mxu1 %v1225_v9  ;;  %1094 = vmatprep.mubr.msk.bf16.mxu1 %vm1226_vm1, %v1225_v9  ;;  %s1604_s5 = sld [smem:[#allocation8_spill]]  ;;  %vm455_vm8 = vcmask 1043456   ;;  %vm439_vm9 = vcmask 64512   ;;  %vm714_vm10 = vcmask 523264  }
  0x1b   :  { %s1605_s28 = sld [smem:[#allocation9_spill]] }
  0x1c   :  { %s1606_s29 = sld [smem:[#allocation11_spill]] }
  0x1d   :  { %s1009_s0 = sld [smem:[#allocation4 + $0x2]] }
  0x1e   :  { %v1366_v1 = vld [vmem:[%s1602_s7] sm:$0xff]  ;;  %s1008_s7 = sld [smem:[#allocation4 + $0x1]] }
  0x1f   :  { %v98_v2 = vsel %vm97_vm0, %v1366_v1, 0.0  ;;  %v1170_v8 = vld [vmem:[%s1603_s3 + $0x8] sm:$0xff]   ;;  %v1171_v10 = vld [vmem:[%s1603_s3] sm:$0xff]   ;;  %s1011_s22 = sld [smem:[#allocation4 + $0x81]] }
  0x20   :  { %99 = vadd.xlane.f32.xlu0 %v98_v2  ;;  %1083 = vmatpush3.bf16.msra.mxu0 %v1170_v8  ;;  %v1002_v15 = vld [vmem:[%s1604_s5] ss:$0 sm:$0xff]  ;;  %s1012_s30 = sld [smem:[#allocation4 + $0x82]]  ;;  %s1229_s5 = smov 127  }
  0x21   :  { %1084 = vmatprep.subr.bf16.mxu0 %v1225_v9  ;;  %v1003_v17 = vld [vmem:[%s1605_s28] ss:$0 sm:$0xff]  ;;  %s1405_s3 = sld [smem:[#allocation4 + $0x101]] }
  0x22   :  { %v1004_v21 = vld [vmem:[%s1606_s29] ss:$0 sm:$0xff]  ;;  %s1407_s25 = sld [smem:[#allocation4 + $0x80]] }
  0x23   :  { %s1410_s8 = sld [smem:[#allocation4 + $0x100]]  ;;  %v226_v31 = vstv %s1009_s0 }
  0x24   :  { %1085 = vmatpush3.bf16.msra.mxu0 %v1171_v10  ;;  %s1412_s4 = sld [smem:[#allocation4 + $0x102]]  ;;  %v218_v32 = vstv %s1008_s7  ;;  %s1231_s7 = smov 64  }
  0x25   :  { %1098 = vmatprep.subr.bf16.mxu0 %v1225_v9  ;;  %v246_v33 = vstv %s1011_s22  ;;  %s1607_s28 = sld [smem:[#allocation12_spill]] }
  0x26   :  { %v259_v34 = vstv %s1012_s30  ;;  %s213_s29 = sld [smem:[#allocation4]] }
  0x27   :  { %v284_v43 = vstv %s1405_s3  ;;  %s1608_s3 = sld [smem:[#allocation13_spill]] }
  0x28   :  { %v234_v46 = vstv %s1407_s25 }
  0x29   :  { %v272_v47 = vstv %s1410_s8 }
  0x2a   :  { %v297_v51 = vstv %s1412_s4 }
  0xa9   :  { %v100_v3 = vpop.xlane.xlu0 %99 }
  0xaa   :  { %v102_v4 = vmul.f32 0.03125, %v100_v3 }
  0xac   :  { %v103_v5 = vsub.f32 %v1366_v1, %v102_v4 }
  0xae   :  { %v104_v6 = vmul.f32 %v103_v5, %v103_v5 }
  0xb0   :  { %v105_v7 = vsel %vm97_vm0, %v104_v6, 0.0 }
  0xb1   :  { %106 = vadd.xlane.f32.xlu0 %v105_v7 }
 0x13a   :  { %v107_v11 = vpop.xlane.xlu0 %106 }
 0x13b   :  { %v108_v12 = vmul.f32 0.03125, %v107_v11  ;;  %v1172_v11 = vld [vmem:[%s1607_s28 + $0x8] sm:$0xff]  }
 0x13c   :  { %1091 = vmatpush3.bf16.msra.mxu1 %v1172_v11 }
 0x13d   :  { %v109_v13 = vadd.f32 1e-05, %v108_v12  ;;  %v1173_v12 = vld [vmem:[%s1607_s28] sm:$0xff]   ;;  %1092 = vmatprep.subr.bf16.mxu1 %v1225_v9 }
 0x13f   :  { %1188 = vrsqrt.f32 %v109_v13  ;;  %v214_v13 = vstv %s213_s29 }
 0x140   :  { %1093 = vmatpush3.bf16.msra.mxu1 %v1173_v12 }
 0x141   :  { %1104 = vmatprep.subr.bf16.mxu1 %v1225_v9 }
 0x14c   :  { %v1189_v14 = vpop.eup %1188 }
 0x14d   :  { %v111_v16 = vmul.f32 %v1189_v14, %v103_v5 }
 0x14f   :  { %v118_v18 = vmul.f32 %v1002_v15, %v111_v16 }
 0x151   :  { %v1392_v19 = vadd.f32 %v1003_v17, %v118_v18 }
 0x153   :  { %v130_v20 = vpack.c.bf16 %v1392_v19, %v1392_v19 }
 0x155   :  { %1087 = vmatmul.mubr.msk.bf16.vlgmr.msra.gmra.mxu0 %vm97_vm0, %v130_v20 }
 0x156   :  { %1100 = vmatprep.mubr.msk.bf16.mxu0 %vm1226_vm1, %v1225_v9 }
 0x215   :  { %v187_v22 = vpop.f32.mrf.mxu0 }
 0x216   :  { %v1402_v23 = vadd.f32 %v1004_v21, %v187_v22 }
 0x217   :  { %v1088_v24 = vpop.f32.mrf.mxu0 }
 0x218   :  { %200 = vrot.lane.b32.xlu1 %v1402_v23, %s1227_s21  ;;  %s1610_s21 = sld [smem:[#allocation15_spill]] }
 0x219   :  { %v190_v25 = vpop.f32.mrf.mxu0 }
 0x21b   :  { %v1089_v26 = vpop.f32.mrf.mxu0 }
 0x28a   :  { %v201_v27 = vpop.permute.xlu1 %200 }
 0x28b   :  { %v204_v28 = vsel %vm203_vm2, 0.0, %v201_v27 }
 0x28c   :  { %v206_v29 = vsel %vm205_vm3, %v204_v28, 0.0 }
 0x28d   :  { %v208_v30 = vrot.slane %v206_v29, 7  ;;  %v310_v29 = vstv %s1588_s23  ;;  %s1230_s23 = smov 96  }
 0x28f   :  { %v211_v35 = vsel %vm210_vm4, 0.0, %v208_v30  ;;  %v212_v36 = vsel %vm210_vm4, %v208_v30, 0.0 }
 0x290   :  { %v227_v37 = vmul.f32 %v226_v31, %v211_v35  ;;  %v219_v38 = vmul.f32 %v218_v32, %v211_v35  ;;  %v247_v39 = vmul.f32 %v246_v33, %v211_v35  ;;  %v248_v40 = vmul.f32 %v246_v33, %v212_v36 }
 0x291   :  { %v260_v41 = vmul.f32 %v259_v34, %v211_v35  ;;  %v261_v42 = vmul.f32 %v259_v34, %v212_v36  ;;  %v285_v49 = vmul.f32 %v284_v43, %v211_v35  ;;  %v286_v50 = vmul.f32 %v284_v43, %v212_v36 }
 0x292   :  { %229 = vrot.lane.b32.xlu0 %v227_v37, %s1228_s1  ;;  %221 = vrot.lane.b32.xlu1 %v219_v38, %s1229_s5  ;;  %v251_v44 = vrot.slane %v247_v39, 1  ;;  %v252_v45 = vrot.slane %v248_v40, 1  ;;  %v235_v54 = vmul.f32 %v234_v46, %v211_v35  ;;  %v236_v55 = vmul.f32 %v234_v46, %v212_v36 }
 0x293   :  { %v264_v52 = vrot.slane %v260_v41, 1  ;;  %v265_v53 = vrot.slane %v261_v42, 1  ;;  %v273_v56 = vmul.f32 %v272_v47, %v211_v35  ;;  %v274_v57 = vmul.f32 %v272_v47, %v212_v36 }
 0x294   :  { %v253_v48 = vsel %vm239_vm5, %v251_v44, %v252_v45  ;;  %v240_v58 = vrot.slane %v235_v54, 1  ;;  %v241_v59 = vrot.slane %v236_v55, 1  ;;  %v298_v60 = vmul.f32 %v297_v51, %v211_v35 }
 0x295   :  { %v299_v61 = vmul.f32 %v297_v51, %v212_v36  ;;  %v278_v62 = vrot.slane %v273_v56, 2  ;;  %v279_v63 = vrot.slane %v274_v57, 2  ;;  %v266_v0 = vsel %vm239_vm5, %v264_v52, %v265_v53 }
 0x296   :  { %254 = vrot.lane.b32.xlu1 %v253_v48, %s1229_s5  ;;  %v289_v2 = vrot.slane %v285_v49, 2  ;;  %v290_v3 = vrot.slane %v286_v50, 2  ;;  %v242_v4 = vsel %vm239_vm5, %v240_v58, %v241_v59  ;;  %v302_v7 = vrot.slane %v298_v60, 2 }
 0x297   :  { %v280_v5 = vsel %vm277_vm6, %v278_v62, %v279_v63  ;;  %v303_v8 = vrot.slane %v299_v61, 2  ;;  %v215_v14 = vmul.f32 %v214_v13, %v211_v35  ;;  %v193_v55 = vsub.f32 0.0, %v1402_v23  ;;  %v1175_v13 = vld [vmem:[%s1608_s3] sm:$0xff]  }
 0x298   :  { %v291_v6 = vsel %vm277_vm6, %v289_v2, %v290_v3 }
 0x299   :  { %v304_v10 = vsel %vm277_vm6, %v302_v7, %v303_v8  ;;  %v194_v56 = vmul.f32 1.442695, %v193_v55  ;;  %v1174_v7 = vld [vmem:[%s1608_s3 + $0x8] sm:$0xff]  }
 0x29a   :  { %267 = vrot.lane.b32.xlu1 %v266_v0, %s1228_s1 }
 0x29e   :  { %292 = vrot.lane.b32.xlu1 %v291_v6, %s1229_s5  ;;  %s1609_s5 = sld [smem:[#allocation14_spill]] }
 0x2a2   :  { %305 = vrot.lane.b32.xlu1 %v304_v10, %s1228_s1 }
 0x304   :  { %v222_v15 = vpop.permute.xlu1 %221  ;;  %v230_v17 = vpop.permute.xlu0 %229 }
 0x305   :  { %v224_v16 = vadd.f32 %v222_v15, %v215_v14 }
 0x307   :  { %v232_v18 = vadd.f32 %v230_v17, %v224_v16 }
 0x308   :  { %v255_v20 = vpop.permute.xlu1 %254 }
 0x309   :  { %v244_v21 = vadd.f32 %v242_v4, %v232_v18 }
 0x30b   :  { %v257_v22 = vadd.f32 %v255_v20, %v244_v21 }
 0x30c   :  { %v268_v24 = vpop.permute.xlu1 %267 }
 0x30d   :  { %v270_v25 = vadd.f32 %v268_v24, %v257_v22  ;;  %v1022_v22 = vld [vmem:[%s1609_s5] ss:$0 sm:$0xff] }
 0x30f   :  { %v282_v26 = vadd.f32 %v280_v5, %v270_v25 }
 0x310   :  { %v293_v27 = vpop.permute.xlu1 %292 }
 0x311   :  { %v295_v28 = vadd.f32 %v293_v27, %v282_v26 }
 0x314   :  { %v306_v30 = vpop.permute.xlu1 %305 }
 0x315   :  { %v308_v31 = vadd.f32 %v306_v30, %v295_v28 }
 0x317   :  { %v311_v32 = vadd.f32 %v310_v29, %v308_v31 }
 0x319   :  { %v313_v33 = vmul.f32 0.70710677, %v311_v32  ;;  %v312_v35 = vmul.f32 0.5, %v311_v32 }
 0x31b   :  { %1190 = verf.f32 %v313_v33 }
 0x328   :  { %v1191_v34 = vpop.eup %1190 }
 0x329   :  { %v315_v36 = vadd.f32 1.0, %v1191_v34 }
 0x32b   :  { %v1441_v37 = vmul.f32 %v315_v36, %v312_v35 }
 0x32d   :  { %v321_v38 = vpack.c.bf16 %v1441_v37, %v1441_v37 }
 0x32f   :  { %1095 = vmatmul.mubr.msk.bf16.vlgmr.msra.gmra.mxu1 %vm97_vm0, %v321_v38  ;;  %v1176_v38 = vld [vmem:[%s1575_s10 + $0x8] sm:$0xff]  }
 0x330   :  { %1106 = vmatprep.mubr.msk.bf16.mxu1 %vm1226_vm1, %v1225_v9 }
 0x3ef   :  { %v371_v39 = vpop.f32.mrf.mxu1 }
 0x3f0   :  { %v378_v40 = vmin.f32 %v371_v39, 0.0  ;;  %vm377_vm7 = vcmp.gt.f32.partialorder %v371_v39, 0.0  ;;  %v384_v51 = vpack.c.bf16 %v371_v39, %v371_v39 }
 0x3f1   :  { %v1096_v41 = vpop.f32.mrf.mxu1 }
 0x3f2   :  { %v379_v42 = vmul.f32 1.442695, %v378_v40 }
 0x3f3   :  { %v374_v43 = vpop.f32.mrf.mxu1 }
 0x3f4   :  { %1192 = vpow2.f32 %v379_v42  ;;  %v1026_v42 = vld [vmem:[%s1610_s21] ss:$0 sm:$0xff] }
 0x3f5   :  { %v1097_v44 = vpop.f32.mrf.mxu1  ;;  %1194 = vpow2.f32 %v194_v56 }
 0x3f6   :  { %v1027_v44 = vld [vmem:[%s1574_s9] ss:$0 sm:$0xff] }
 0x401   :  { %v1193_v45 = vpop.eup %1192 }
 0x402   :  { %v1019_v46 = vadd.f32 -1.0, %v1193_v45  ;;  %v1195_v62 = vpop.eup %1194 }
 0x403   :  { %v196_v0 = vadd.f32 1.0, %v1195_v62 }
 0x404   :  { %v382_v47 = vsel %vm377_vm7, %v371_v39, %v1019_v46 }
 0x405   :  { %v383_v48 = vadd.f32 1.0, %v382_v47  ;;  %1196 = vrcp.f32 %v196_v0  ;;  %v1032_v0 = vld [vmem:[%s1578_s13] ss:$0 sm:$0xff] }
 0x407   :  { %v385_v49 = vpack.c.bf16 %v383_v48, %v383_v48  ;;  %v1178_v48 = vld [vmem:[%s1577_s12 + $0x18] sm:$0xff]  }
 0x409   :  { %390 = vrot.lane.b32.xlu1 %v385_v49, %s1230_s23  ;;  %v457_v50 = vsel %vm455_vm8, %v385_v49, 0  ;;  %v1179_v49 = vld [vmem:[%s1577_s12 + $0x10] sm:$0xff]  }
 0x40a   :  { %1105 = vmatpush3.bf16.msra.mxu1 %v457_v50  ;;  %v1180_v50 = vld [vmem:[%s1577_s12 + $0x8] sm:$0xff]  }
 0x40b   :  { %1118 = vmatprep.subr.bf16.mxu1 %v1225_v9 }
 0x40d   :  { %387 = vrot.lane.b32.xlu1 %v384_v51, %s1231_s7  ;;  %v1181_v51 = vld [vmem:[%s1577_s12] sm:$0xff]  }
 0x412   :  { %v1197_v2 = vpop.eup %1196 }
 0x47b   :  { %v391_v52 = vpop.permute.xlu1 %390 }
 0x47c   :  { %v396_v53 = vsel %vm97_vm0, %v391_v52, 0  ;;  %v1028_v52 = vld [vmem:[%s1576_s11] ss:$0 sm:$0xff] }
 0x47d   :  { %1099 = vmatpush3.bf16.xpose.msra.mxu0 %v396_v53 }
 0x47e   :  { %1110 = vmatprep.subr.bf16.mxu0 %v1225_v9 }
 0x47f   :  { %v388_v54 = vpop.permute.xlu1 %387 }
 0x484   :  { %1101 = vmatmul.mubr.msk.bf16.vlgmr.msra.gmra.mxu0 %vm97_vm0, %v388_v54 }
 0x485   :  { %1114 = vmatprep.mubr.msk.bf16.mxu0 %vm1226_vm1, %v1225_v9  ;;  %1111 = vmatpush3.bf16.msra.mxu0 %v1174_v7 }
 0x486   :  { %1112 = vmatprep.subr.bf16.mxu0 %v1225_v9 }
 0x489   :  { %1113 = vmatpush3.bf16.msra.mxu0 %v1175_v13 }
 0x48a   :  { %1126 = vmatprep.subr.bf16.mxu0 %v1225_v9 }
 0x544   :  { %v432_v57 = vpop.f32.mrf.mxu0 }
 0x545   :  { %v438_v58 = vmul.f32 0.17677669, %v432_v57 }
 0x546   :  { %v1102_v59 = vpop.f32.mrf.mxu0 }
 0x547   :  { %v440_v60 = vsel %vm439_vm9, %v438_v58, -inf }
 0x548   :  { %441 = vmax.xlane.f32.xlu0 %v440_v60  ;;  %v435_v61 = vpop.f32.mrf.mxu0 }
 0x54a   :  { %v1103_v63 = vpop.f32.mrf.mxu0 }
 0x55e   :  { %500 = vrot.lane.b32.xlu0 %v1197_v2, %s1230_s23 }
 0x5d1   :  { %v442_v3 = vpop.xlane.xlu0 %441 }
 0x5d2   :  { %v443_v4 = vsub.f32 %v438_v58, %v442_v3 }
 0x5d4   :  { %v444_v5 = vmul.f32 1.442695, %v443_v4 }
 0x5d5   :  { %v501_v14 = vpop.permute.xlu0 %500 }
 0x5d6   :  { %1198 = vpow2.f32 %v444_v5 }
 0x5e3   :  { %v1199_v23 = vpop.eup %1198 }
 0x5e4   :  { %v446_v6 = vsel %vm439_vm9, %v1199_v23, 0.0 }
 0x5e5   :  { %447 = vadd.xlane.f32.xlu1 %v446_v6 }
 0x66e   :  { %v448_v8 = vpop.xlane.xlu1 %447 }
 0x66f   :  { %1200 = vrcp.f32 %v448_v8 }
 0x67c   :  { %v1201_v10 = vpop.eup %1200 }
 0x67d   :  { %v450_v11 = vmul.f32 %v1201_v10, %v1199_v23 }
 0x67f   :  { %v451_v12 = vpack.c.bf16 %v450_v11, %v450_v11 }
 0x681   :  { %1107 = vmatmul.mubr.msk.bf16.vlgmr.msra.gmra.mxu1 %vm439_vm9, %v451_v12 }
 0x682   :  { %1122 = vmatprep.mubr.msk.bf16.mxu1 %vm1226_vm1, %v1225_v9  ;;  %1119 = vmatpush3.bf16.msra.mxu1 %v1176_v38 }
 0x683   :  { %1120 = vmatprep.subr.bf16.mxu1 %v1225_v9 }
 0x741   :  { %v493_v15 = vpop.f32.mrf.mxu1 }
 0x742   :  { %v503_v16 = vmul.f32 %v501_v14, %v493_v15  ;;  %v1182_v15 = vld [vmem:[%s1581_s16 + $0x8] sm:$0xff]  }
 0x743   :  { %v1108_v17 = vpop.f32.mrf.mxu1 }
 0x744   :  { %v508_v18 = vpack.c.bf16 %v503_v16, %v503_v16 }
 0x745   :  { %v496_v20 = vpop.f32.mrf.mxu1 }
 0x746   :  { %1115 = vmatmul.mubr.msk.bf16.vlgmr.msra.gmra.mxu0 %vm97_vm0, %v508_v18 }
 0x747   :  { %v1109_v21 = vpop.f32.mrf.mxu1  ;;  %1134 = vmatprep.mubr.msk.bf16.mxu0 %vm1226_vm1, %v1225_v9  ;;  %1127 = vmatpush3.bf16.msra.mxu0 %v1178_v48 }
 0x748   :  { %1128 = vmatprep.subr.bf16.mxu0 %v1225_v9  ;;  %v1038_v21 = vld [vmem:[%s1579_s14] ss:$0 sm:$0xff] }
 0x74b   :  { %1129 = vmatpush3.bf16.msra.mxu0 %v1179_v49 }
 0x74c   :  { %1130 = vmatprep.subr.bf16.mxu0 %v1225_v9 }
 0x74f   :  { %1131 = vmatpush3.bf16.msra.mxu0 %v1180_v50 }
 0x750   :  { %1132 = vmatprep.subr.bf16.mxu0 %v1225_v9 }
 0x753   :  { %1133 = vmatpush3.bf16.msra.mxu0 %v1181_v51  ;;  %v1048_v51 = vld [vmem:[#allocation2] ss:$0 sm:$0xff] }
 0x754   :  { %1154 = vmatprep.subr.bf16.mxu0 %v1225_v9 }
 0x806   :  { %v565_v24 = vpop.f32.mrf.mxu0 }
 0x807   :  { %v566_v25 = vadd.f32 %v1022_v22, %v565_v24  ;;  %v1039_v24 = vld [vmem:[%s1580_s15] ss:$0 sm:$0xff] }
 0x808   :  { %v1116_v26 = vpop.f32.mrf.mxu0 }
 0x809   :  { %v571_v27 = vadd.f32 %v566_v25, %v1441_v37 }
 0x80a   :  { %v568_v28 = vpop.f32.mrf.mxu0 }
 0x80b   :  { %v572_v29 = vadd.f32 %v571_v27, %v1392_v19  ;;  %v1177_v19 = vld [vmem:[%s1575_s10] sm:$0xff]   ;;  %v1184_v28 = vld [vmem:[%s1583_s18 + $0x8] sm:$0xff]  }
 0x80c   :  { %v1117_v30 = vpop.f32.mrf.mxu0  ;;  %1121 = vmatpush3.bf16.msra.mxu1 %v1177_v19 }
 0x80d   :  { %v575_v31 = vsel %vm97_vm0, %v572_v29, 0.0  ;;  %1138 = vmatprep.subr.bf16.mxu1 %v1225_v9  ;;  %v1040_v30 = vld [vmem:[%s1582_s17] ss:$0 sm:$0xff] }
 0x80e   :  { %576 = vadd.xlane.f32.xlu1 %v575_v31 }
 0x897   :  { %v577_v32 = vpop.xlane.xlu1 %576 }
 0x898   :  { %v578_v33 = vmul.f32 0.03125, %v577_v32 }
 0x89a   :  { %v579_v34 = vsub.f32 %v572_v29, %v578_v33 }
 0x89c   :  { %v580_v35 = vmul.f32 %v579_v34, %v579_v34 }
 0x89e   :  { %v581_v36 = vsel %vm97_vm0, %v580_v35, 0.0 }
 0x89f   :  { %582 = vadd.xlane.f32.xlu1 %v581_v36 }
 0x928   :  { %v583_v37 = vpop.xlane.xlu1 %582 }
 0x929   :  { %v584_v39 = vmul.f32 0.03125, %v583_v37 }
 0x92b   :  { %v585_v40 = vadd.f32 1e-05, %v584_v39 }
 0x92d   :  { %1202 = vrsqrt.f32 %v585_v40 }
 0x93a   :  { %v1203_v41 = vpop.eup %1202 }
 0x93b   :  { %v587_v43 = vmul.f32 %v1203_v41, %v579_v34  ;;  %v1186_v41 = vld [vmem:[%s1585_s20 + $0x8] sm:$0xff]  }
 0x93d   :  { %v594_v45 = vmul.f32 %v1026_v42, %v587_v43  ;;  %v1187_v42 = vld [vmem:[%s1585_s20] sm:$0xff]  }
 0x93e   :  { %v1044_v43 = vld [vmem:[%s1584_s19] ss:$0 sm:$0xff] }
 0x93f   :  { %v601_v46 = vadd.f32 %v1027_v44, %v594_v45 }
 0x941   :  { %v606_v47 = vpack.c.bf16 %v601_v46, %v601_v46 }
 0x943   :  { %1123 = vmatmul.mubr.msk.bf16.vlgmr.msra.gmra.mxu1 %vm97_vm0, %v606_v47 }
 0x944   :  { %1142 = vmatprep.mubr.msk.bf16.mxu1 %vm1226_vm1, %v1225_v9  ;;  %1139 = vmatpush3.bf16.msra.mxu1 %v1182_v15 }
 0x945   :  { %1140 = vmatprep.subr.bf16.mxu1 %v1225_v9 }
 0xa03   :  { %v663_v53 = vpop.f32.mrf.mxu1 }
 0xa04   :  { %v664_v54 = vadd.f32 %v1028_v52, %v663_v53 }
 0xa05   :  { %v1124_v55 = vpop.f32.mrf.mxu1 }
 0xa06   :  { %v670_v56 = vmul.f32 0.70710677, %v664_v54  ;;  %v669_v60 = vmul.f32 0.5, %v664_v54 }
 0xa07   :  { %v666_v57 = vpop.f32.mrf.mxu1 }
 0xa08   :  { %1204 = verf.f32 %v670_v56 }
 0xa09   :  { %v1125_v58 = vpop.f32.mrf.mxu1 }
 0xa15   :  { %v1205_v59 = vpop.eup %1204 }
 0xa16   :  { %v672_v61 = vadd.f32 1.0, %v1205_v59 }
 0xa18   :  { %v673_v62 = vmul.f32 %v672_v61, %v669_v60 }
 0xa1a   :  { %v682_v63 = vpack.c.bf16 %v673_v62, %v673_v62 }
 0xa1c   :  { %1135 = vmatmul.mubr.msk.bf16.vlgmr.msra.gmra.mxu0 %vm714_vm10, %v682_v63 }
 0xa1d   :  { %1158 = vmatprep.mubr.msk.bf16.mxu0 %vm1226_vm1, %v1225_v9  ;;  %1155 = vmatpush3.bf16.msra.mxu0 %v1186_v41 }
 0xa1e   :  { %1156 = vmatprep.subr.bf16.mxu0 %v1225_v9 }
 0xa21   :  { %1157 = vmatpush3.bf16.msra.mxu0 %v1187_v42 }
 0xadc   :  { %v752_v2 = vpop.f32.mrf.mxu0 }
 0xadd   :  { %v753_v3 = vadd.f32 %v1032_v0, %v752_v2 }
 0xade   :  { %v1136_v4 = vpop.f32.mrf.mxu0 }
 0xadf   :  { %v758_v5 = vadd.f32 %v753_v3, %v572_v29  ;;  %v1185_v29 = vld [vmem:[%s1583_s18] sm:$0xff]  }
 0xae0   :  { %v755_v23 = vpop.f32.mrf.mxu0 }
 0xae1   :  { %v759_v6 = vadd.f32 %v758_v5, %v1366_v1  ;;  %v1183_v1 = vld [vmem:[%s1581_s16] sm:$0xff]  }
 0xae2   :  { %v1137_v7 = vpop.f32.mrf.mxu0  ;;  %1141 = vmatpush3.bf16.msra.mxu1 %v1183_v1 }
 0xae3   :  { %v762_v8 = vsel %vm97_vm0, %v759_v6, 0.0  ;;  %1146 = vmatprep.subr.bf16.mxu1 %v1225_v9 }
 0xae4   :  { %763 = vadd.xlane.f32.xlu1 %v762_v8 }
 0xb6d   :  { %v764_v10 = vpop.xlane.xlu1 %763 }
 0xb6e   :  { %v765_v11 = vmul.f32 0.03125, %v764_v10 }
 0xb70   :  { %v766_v12 = vsub.f32 %v759_v6, %v765_v11 }
 0xb72   :  { %v767_v13 = vmul.f32 %v766_v12, %v766_v12 }
 0xb74   :  { %v768_v14 = vsel %vm97_vm0, %v767_v13, 0.0 }
 0xb75   :  { %769 = vadd.xlane.f32.xlu1 %v768_v14 }
 0xbfe   :  { %v770_v16 = vpop.xlane.xlu1 %769 }
 0xbff   :  { %v771_v17 = vmul.f32 0.03125, %v770_v16 }
 0xc01   :  { %v772_v18 = vadd.f32 1e-05, %v771_v17 }
 0xc03   :  { %1206 = vrsqrt.f32 %v772_v18 }
 0xc10   :  { %v1207_v20 = vpop.eup %1206 }
 0xc11   :  { %v774_v22 = vmul.f32 %v1207_v20, %v766_v12 }
 0xc13   :  { %v781_v25 = vmul.f32 %v1038_v21, %v774_v22 }
 0xc15   :  { %v788_v26 = vadd.f32 %v1039_v24, %v781_v25 }
 0xc17   :  { %v793_v27 = vpack.c.bf16 %v788_v26, %v788_v26 }
 0xc19   :  { %1143 = vmatmul.mubr.msk.bf16.vlgmr.msra.gmra.mxu1 %vm97_vm0, %v793_v27 }
 0xc1a   :  { %1150 = vmatprep.mubr.msk.bf16.mxu1 %vm1226_vm1, %v1225_v9  ;;  %1147 = vmatpush3.bf16.msra.mxu1 %v1184_v28 }
 0xc1b   :  { %1148 = vmatprep.subr.bf16.mxu1 %v1225_v9 }
 0xc1e   :  { %1149 = vmatpush3.bf16.msra.mxu1 %v1185_v29 }
 0xcd9   :  { %v850_v31 = vpop.f32.mrf.mxu1 }
 0xcda   :  { %v851_v32 = vadd.f32 %v1040_v30, %v850_v31 }
 0xcdb   :  { %v1144_v33 = vpop.f32.mrf.mxu1 }
 0xcdc   :  { %v857_v34 = vmul.f32 0.70710677, %v851_v32  ;;  %v856_v19 = vmul.f32 0.5, %v851_v32 }
 0xcdd   :  { %v853_v35 = vpop.f32.mrf.mxu1 }
 0xcde   :  { %1208 = verf.f32 %v857_v34 }
 0xcdf   :  { %v1145_v36 = vpop.f32.mrf.mxu1 }
 0xceb   :  { %v1209_v38 = vpop.eup %1208 }
 0xcec   :  { %v859_v37 = vadd.f32 1.0, %v1209_v38 }
 0xcee   :  { %v860_v39 = vmul.f32 %v859_v37, %v856_v19 }
 0xcf0   :  { %v865_v40 = vpack.c.bf16 %v860_v39, %v860_v39 }
 0xcf2   :  { %1151 = vmatmul.mubr.msk.bf16.vlgmr.msra.gmra.mxu1 %vm97_vm0, %v865_v40 }
 0xdb2   :  { %v922_v44 = vpop.f32.mrf.mxu1 }
 0xdb3   :  { %v923_v45 = vadd.f32 %v1044_v43, %v922_v44 }
 0xdb4   :  { %v1152_v46 = vpop.f32.mrf.mxu1 }
 0xdb5   :  { %v928_v47 = vadd.f32 %v923_v45, %v759_v6 }
 0xdb6   :  { %v925_v48 = vpop.f32.mrf.mxu1 }
 0xdb7   :  { %v933_v49 = vpack.c.bf16 %v928_v47, %v928_v47 }
 0xdb8   :  { %v1153_v50 = vpop.f32.mrf.mxu1 }
 0xdb9   :  { %1159 = vmatmul.mubr.msk.bf16.vlgmr.msra.gmra.mxu0 %vm97_vm0, %v933_v49 }
 0xe79   :  { %v990_v52 = vpop.f32.mrf.mxu0 }
 0xe7a   :  { %v991_v53 = vadd.f32 %v1048_v51, %v990_v52 }
 0xe7b   :  { %v1160_v54 = vpop.f32.mrf.mxu0 }
 0xe7c   :  { %996 = vst.msk [vmem:[%s1589_s24] sm:$0xff] %vm203_vm2, %v991_v53 }
 0xe7d   :  { %v993_v9 = vpop.f32.mrf.mxu0 }
 0xe7f   :  { %v1161_v55 = vpop.f32.mrf.mxu0 }
 0xe80   :  { %1001 = vsyncpa [#allocation5], 1 }

</bundles_post_ra>
